<compile_context>
chip_gen: v6e
topology: v6e:2x2x1
jax: 0.10.0
libtpu: 0.0.40
codegen_flags: <defaults>
</compile_context>

<pallas_src>
import functools
import math

import jax
import jax.numpy as jnp
from jax.experimental import pallas as pl
from jax.experimental.pallas import tpu as pltpu


def _layernorm(h, w, b, eps=1e-5):
    mu = jnp.mean(h, axis=-1, keepdims=True)
    var = jnp.mean((h - mu) ** 2, axis=-1, keepdims=True)
    return (h - mu) * jax.lax.rsqrt(var + eps) * w + b


def _gelu_tanh(a):
    # matches torch.nn.GELU(approximate='tanh')
    return 0.5 * a * (1.0 + jnp.tanh(0.7978845608028654 * (a + 0.044715 * a * a * a)))


def block_kernel(x_ref,
                 ln1w_ref, ln1b_ref,
                 wqkv_ref, bqkv_ref,
                 wap_ref, bap_ref,
                 ln2w_ref, ln2b_ref,
                 wfc_ref, bfc_ref,
                 wmp_ref, bmp_ref,
                 o_ref,
                 qs_ref, ks_ref, vs_ref,
                 m_sc, l_sc, acc_sc,
                 *, n_head, q_tile, compute_dtype):
    f32 = jnp.float32
    _, T, C = x_ref.shape                 # padded sequence length, embed dim
    hd = C // n_head
    t = pl.program_id(1)                  # row-tile index (fast grid axis)
    scale = 1.0 / math.sqrt(hd)

    def mm(a, w_ref, b_ref):
        # MXU contraction in compute_dtype with f32 accumulation; bias add in f32.
        return (jnp.dot(a.astype(compute_dtype), w_ref[...].astype(compute_dtype),
                        preferred_element_type=f32) + b_ref[...])

    # ---- once per batch element: ln_1 + fused qkv projection -> head-major scratch ----
    @pl.when(t == 0)
    def _():
        x_full = x_ref[0].astype(f32)                              # (T, C)
        h1 = _layernorm(x_full, ln1w_ref[...], ln1b_ref[...])
        qkv = mm(h1, wqkv_ref, bqkv_ref)                           # (T, 3C) f32
        # Three lane slices (q/k/v), one reshape+transpose each: no per-head slicing.
        q = qkv[:, 0 * C:1 * C].reshape(T, n_head, hd)
        k = qkv[:, 1 * C:2 * C].reshape(T, n_head, hd)
        v = qkv[:, 2 * C:3 * C].reshape(T, n_head, hd)
        qs_ref[...] = (jnp.transpose(q, (1, 0, 2)) * scale).astype(compute_dtype)
        ks_ref[...] = jnp.transpose(k, (1, 0, 2)).astype(compute_dtype)
        vs_ref[...] = jnp.transpose(v, (1, 0, 2)).astype(compute_dtype)

    # ---- flash-style causal attention for this row tile ----
    r0 = pl.multiple_of(t * q_tile, q_tile)
    q_t = qs_ref[:, pl.ds(r0, q_tile), :]                          # (H, Tq, hd)
    rows = t * q_tile + jax.lax.broadcasted_iota(jnp.int32, (q_tile, q_tile), 0)

    m_sc[...] = jnp.full(m_sc.shape, -jnp.inf, f32)
    l_sc[...] = jnp.zeros(l_sc.shape, f32)
    acc_sc[...] = jnp.zeros(acc_sc.shape, f32)

    @pl.loop(0, t + 1)                                             # causal skip: KV blocks <= t
    def _(j):
        c0 = pl.multiple_of(j * q_tile, q_tile)
        k_j = ks_ref[:, pl.ds(c0, q_tile), :]                      # (H, Tk, hd)
        v_j = vs_ref[:, pl.ds(c0, q_tile), :]
        # head-batched scores (leading batch dim h), f32 accumulation
        s = jax.lax.dot_general(q_t, k_j, (((2,), (2,)), ((0,), (0,))),
                                preferred_element_type=f32)        # (H, Tq, Tk)
        cols = j * q_tile + jax.lax.broadcasted_iota(jnp.int32, (q_tile, q_tile), 1)
        s = jnp.where((rows >= cols)[None, :, :], s, -1e30)
        m_prev = m_sc[...]
        m_new = jnp.maximum(m_prev, jnp.max(s, axis=-1, keepdims=True))
        alpha = jnp.exp(m_prev - m_new)
        p = jnp.exp(s - m_new)
        l_sc[...] = alpha * l_sc[...] + jnp.sum(p, axis=-1, keepdims=True)
        pv = jax.lax.dot_general(p.astype(compute_dtype), v_j,
                                 (((2,), (1,)), ((0,), (0,))),
                                 preferred_element_type=f32)       # (H, Tq, hd)
        acc_sc[...] = alpha * acc_sc[...] + pv
        m_sc[...] = m_new

    y_hm = acc_sc[...] / l_sc[...]                                 # exact normalization (f32)
    y = jnp.transpose(y_hm, (1, 0, 2)).reshape(q_tile, C)          # (Tq, C)
    y = mm(y, wap_ref, bap_ref)                                    # attention c_proj

    # ---- residual + ln_2 + MLP for this row tile ----
    x_t = x_ref[0, pl.ds(r0, q_tile), :].astype(f32) + y
    h2 = _layernorm(x_t, ln2w_ref[...], ln2b_ref[...])
    a = mm(h2, wfc_ref, bfc_ref)
    g = _gelu_tanh(a)
    m_out = mm(g, wmp_ref, bmp_ref)
    o_ref[0] = (x_t + m_out).astype(o_ref.dtype)


@functools.lru_cache(maxsize=None)
def _single_buffer_supported():
    """Narrow capability probe: does this jax/Mosaic build accept a grid-invariant
    BlockSpec with pipeline_mode=pl.Buffered(1)?  Probed once on a tiny dedicated
    kernel so a failure here cannot mask errors in the real kernel."""
    def _probe_kernel(w_ref, o_ref):
        o_ref[...] = w_ref[...] + 1.0
    try:
        spec = pl.BlockSpec((8, 128), lambda i: (0, 0), pipeline_mode=pl.Buffered(1))
        probe = pl.pallas_call(
            _probe_kernel,
            out_shape=jax.ShapeDtypeStruct((8, 128), jnp.float32),
            grid_spec=pltpu.PrefetchScalarGridSpec(
                num_scalar_prefetch=0, grid=(2,),
                in_specs=[spec],
                out_specs=pl.BlockSpec((8, 128), lambda i: (0, 0))),
        )
        jax.jit(probe).lower(jnp.zeros((8, 128), jnp.float32)).compile()
        return True
    except Exception:
        return False


def _vmem_capacity_bytes():
    try:
        return int(pltpu.get_tpu_info().vmem_capacity_bytes)
    except Exception:
        return 64 << 20   # conservative default = v7x per-TensorCore VMEM


def gpt2_block(x, params, n_head, *, q_tile=None, compute_dtype=jnp.bfloat16):
    B, T, C = x.shape
    assert C % n_head == 0, "n_embd must be divisible by n_head"
    (ln1w, ln1b, wqkv, bqkv, wap, bap, ln2w, ln2b, wfc, bfc, wmp, bmp) = params

    f32 = jnp.float32
    hd = C // n_head

    # Row-tile size: 256 fills the 2x256 MXUs of v6e/v7x better when T allows, else 128.
    # T is zero-padded to a multiple of q_tile (causal masking keeps pad rows from
    # influencing real rows) instead of falling back to q_tile = T.
    if q_tile is None:
        q_tile = 256 if (T >= 256 and T % 256 == 0) else 128
    q_tile = int(q_tile)
    T_pad = int(pl.cdiv(T, q_tile)) * q_tile
    assert q_tile % 8 == 0 or q_tile == T_pad, "q_tile must be a multiple of 8"
    n_tiles = T_pad // q_tile

    x_in = x if T_pad == T else jnp.pad(x, ((0, 0), (0, T_pad - T), (0, 0)))

    # Big matmul weights in compute_dtype (bf16 by default: halves VMEM residency,
    # doubles MXU rate on v6e/v7x); LN params / biases stay f32 (VPU math in f32).
    wqkv, wap, wfc, wmp = (w.astype(compute_dtype) for w in (wqkv, wap, wfc, wmp))
    ln1w, ln1b, bqkv, bap, ln2w, ln2b, bfc, bmp = (
        w.astype(f32) for w in (ln1w, ln1b, bqkv, bap, ln2w, ln2b, bfc, bmp))
    weights = (ln1w, ln1b, wqkv, bqkv, wap, bap, ln2w, ln2b, wfc, bfc, wmp, bmp)

    kernel = functools.partial(block_kernel, n_head=n_head, q_tile=q_tile,
                               compute_dtype=compute_dtype)

    single = _single_buffer_supported()
    w_factor = 1 if single else 2

    def w_spec(arr):
        if single:
            # grid-invariant weight block -> one VMEM buffer is enough
            return pl.BlockSpec(arr.shape, lambda b, t: (0, 0),
                                pipeline_mode=pl.Buffered(1))
        return pl.BlockSpec(arr.shape, lambda b, t: (0, 0))

    in_specs = ([pl.BlockSpec((1, T_pad, C), lambda b, t: (b, 0, 0))]
                + [w_spec(w) for w in weights])
    out_specs = pl.BlockSpec((1, q_tile, C), lambda b, t: (b, t, 0))

    cdt = jnp.dtype(compute_dtype).itemsize
    xb = x.dtype.itemsize
    w_bytes = sum(int(w.size) * w.dtype.itemsize for w in weights)

    # VMEM budget: persistent residents + the larger of the two in-kernel phases
    # (t==0 qkv build vs. steady-state row tile), clamped to per-core capacity.
    persistent = (w_factor * w_bytes
                  + 2 * T_pad * C * xb            # (1,T,C) input block (double-buffered)
                  + 2 * q_tile * C * xb           # (1,q_tile,C) output block (double-buffered)
                  + 3 * T_pad * C * cdt           # q/k/v scratch
                  + 2 * n_head * q_tile * 4 + n_head * q_tile * hd * 4)  # m/l/acc scratch
    phase_qkv = T_pad * C * 4 + T_pad * 3 * C * 4 + 3 * T_pad * C * cdt
    phase_tile = (2 * n_head * q_tile * q_tile * 4      # scores + probs
                  + 2 * n_head * q_tile * hd * 4        # pv + acc value
                  + 3 * q_tile * 4 * C * 4              # MLP fc / gelu activations
                  + 3 * q_tile * C * 4)                 # y / x_t / h2
    cap = _vmem_capacity_bytes()
    vmem_limit = int(1.25 * (persistent + max(phase_qkv, phase_tile))) + (4 << 20)
    vmem_limit = max(32 << 20, min(vmem_limit, cap - (8 << 20)))

    # Advisory cost estimate (causal attention counted at ~half the dense FLOPs).
    flops = int(B * (24 * T_pad * C * C + 2 * T_pad * T_pad * C))
    transc = int(B * (4 * T_pad * C + n_head * T_pad * T_pad // 2))
    cost = pl.CostEstimate(flops=flops, transcendentals=transc,
                           bytes_accessed=int(w_bytes + 2 * B * T_pad * C * xb))

    out = pl.pallas_call(
        kernel,
        out_shape=jax.ShapeDtypeStruct((B, T_pad, C), x.dtype),
        grid_spec=pltpu.PrefetchScalarGridSpec(
            num_scalar_prefetch=0,
            grid=(B, n_tiles),
            in_specs=in_specs,
            out_specs=out_specs,
            scratch_shapes=[
                pltpu.VMEM((n_head, T_pad, hd), compute_dtype),   # scaled q (head-major)
                pltpu.VMEM((n_head, T_pad, hd), compute_dtype),   # k
                pltpu.VMEM((n_head, T_pad, hd), compute_dtype),   # v
                pltpu.VMEM((n_head, q_tile, 1), f32),             # running max
                pltpu.VMEM((n_head, q_tile, 1), f32),             # running denom
                pltpu.VMEM((n_head, q_tile, hd), f32),            # output accumulator
            ]),
        compiler_params=pltpu.CompilerParams(
            # Batch elements shard across TensorCores; row tiles carry the KV-scratch
            # dependency, so they stay "arbitrary".
            # TODO(synk): with B=1 on v7x one core idles; would need per-core qkv recompute
            # to make the row-tile axis parallel.
            dimension_semantics=("parallel", "arbitrary"),
            vmem_limit_bytes=vmem_limit,
        ),
        cost_estimate=cost,
    )(x_in, *weights)

    return out if T_pad == T else out[:, :T, :]


def init_params(key, n_embd):
    """Deterministic synthetic weights. Linear weights stored as (in, out); biases as (1, out)."""
    ks = jax.random.split(key, 8)
    C = n_embd
    s = 0.02
    ln1w = jnp.ones((1, C), jnp.float32)
    ln1b = jnp.zeros((1, C), jnp.float32)
    wqkv = s * jax.random.normal(ks[0], (C, 3 * C), jnp.float32)
    bqkv = s * jax.random.normal(ks[1], (1, 3 * C), jnp.float32)
    wap = s * jax.random.normal(ks[2], (C, C), jnp.float32)
    bap = s * jax.random.normal(ks[3], (1, C), jnp.float32)
    ln2w = jnp.ones((1, C), jnp.float32)
    ln2b = jnp.zeros((1, C), jnp.float32)
    wfc = s * jax.random.normal(ks[4], (C, 4 * C), jnp.float32)
    bfc = s * jax.random.normal(ks[5], (1, 4 * C), jnp.float32)
    wmp = s * jax.random.normal(ks[6], (4 * C, C), jnp.float32)
    bmp = s * jax.random.normal(ks[7], (1, C), jnp.float32)
    return (ln1w, ln1b, wqkv, bqkv, wap, bap, ln2w, ln2b, wfc, bfc, wmp, bmp)


def reference_block(x, params, n_head):
    """Pure-JAX f32 reference mirroring the PyTorch Block.forward semantics."""
    (ln1w, ln1b, wqkv, bqkv, wap, bap, ln2w, ln2b, wfc, bfc, wmp, bmp) = params
    B, T, C = x.shape
    hd = C // n_head

    h = _layernorm(x, ln1w[0], ln1b[0])
    qkv = h @ wqkv + bqkv[0]
    q, k, v = jnp.split(qkv, 3, axis=-1)
    q = q.reshape(B, T, n_head, hd).transpose(0, 2, 1, 3)
    k = k.reshape(B, T, n_head, hd).transpose(0, 2, 1, 3)
    v = v.reshape(B, T, n_head, hd).transpose(0, 2, 1, 3)
    s = jnp.einsum("bhqd,bhkd->bhqk", q, k) / math.sqrt(hd)
    mask = jnp.tril(jnp.ones((T, T), bool))
    s = jnp.where(mask, s, -1e30)
    p = jax.nn.softmax(s, axis=-1)
    y = jnp.einsum("bhqk,bhkd->bhqd", p, v).transpose(0, 2, 1, 3).reshape(B, T, C)
    y = y @ wap + bap[0]
    x = x + y

    h2 = _layernorm(x, ln2w[0], ln2b[0])
    a = h2 @ wfc + bfc[0]
    g = _gelu_tanh(a)
    m = g @ wmp + bmp[0]
    return x + m


if __name__ == "__main__":
    B, T, C, n_head = 2, 16, 32, 4
    key = jax.random.PRNGKey(0)
    kx, kp = jax.random.split(key)
    x = jax.random.normal(kx, (B, T, C), jnp.float32)
    params = init_params(kp, C)

    ref = reference_block(x, params, n_head)

    # f32 matmul path, q_tile=8 -> 2 row tiles: exercises the flash KV loop, the causal
    # diagonal-block masking and the multi-row-tile grid axis.
    out = jax.block_until_ready(
        gpt2_block(x, params, n_head, q_tile=8, compute_dtype=jnp.float32))
    assert out.shape == (B, T, C)
    assert jnp.allclose(out, ref, atol=1e-3, rtol=1e-3), "f32 kernel mismatch vs reference"

    # default path: bf16 matmuls (f32 accumulation) + automatic padding of T (16 -> 128)
    out_bf16 = jax.block_until_ready(gpt2_block(x, params, n_head))
    assert out_bf16.shape == (B, T, C)
    assert jnp.allclose(out_bf16, ref, atol=1e-2, rtol=1e-2), "bf16 kernel mismatch vs reference"

    print("KERNEL_OK")
</pallas_src>

<mosaic_0001>
module attributes {stable_mosaic.version = 11 : i64} {
  func.func @block_kernel(%arg0: i32, %arg1: i32, %arg2: memref<1x16x32xf32, #tpu.memory_space<vmem>>, %arg3: memref<1x32xf32, #tpu.memory_space<vmem>>, %arg4: memref<1x32xf32, #tpu.memory_space<vmem>>, %arg5: memref<32x96xf32, #tpu.memory_space<vmem>>, %arg6: memref<1x96xf32, #tpu.memory_space<vmem>>, %arg7: memref<32x32xf32, #tpu.memory_space<vmem>>, %arg8: memref<1x32xf32, #tpu.memory_space<vmem>>, %arg9: memref<1x32xf32, #tpu.memory_space<vmem>>, %arg10: memref<1x32xf32, #tpu.memory_space<vmem>>, %arg11: memref<32x128xf32, #tpu.memory_space<vmem>>, %arg12: memref<1x128xf32, #tpu.memory_space<vmem>>, %arg13: memref<128x32xf32, #tpu.memory_space<vmem>>, %arg14: memref<1x32xf32, #tpu.memory_space<vmem>>, %arg15: memref<1x8x32xf32, #tpu.memory_space<vmem>>, %arg16: memref<4x16x8xf32, #tpu.memory_space<vmem>>, %arg17: memref<4x16x8xf32, #tpu.memory_space<vmem>>, %arg18: memref<4x16x8xf32, #tpu.memory_space<vmem>>, %arg19: memref<4x8x1xf32, #tpu.memory_space<vmem>>, %arg20: memref<4x8x1xf32, #tpu.memory_space<vmem>>, %arg21: memref<4x8x8xf32, #tpu.memory_space<vmem>>) attributes {dimension_semantics = [#tpu.dimension_semantics<parallel>, #tpu.dimension_semantics<arbitrary>], iteration_bounds = array<i64: 2, 2>, scalar_prefetch = 0 : i64, scratch_operands = 6 : i64, tpu.core_type = #tpu.core_type<tc>, window_params = [{transform_indices = @transform_0, window_bounds = array<i64: 1, 16, 32>}, {pipeline_mode = #tpu.pipeline_mode<synchronous>, transform_indices = @transform_1, window_bounds = array<i64: 1, 32>}, {pipeline_mode = #tpu.pipeline_mode<synchronous>, transform_indices = @transform_2, window_bounds = array<i64: 1, 32>}, {pipeline_mode = #tpu.pipeline_mode<synchronous>, transform_indices = @transform_3, window_bounds = array<i64: 32, 96>}, {pipeline_mode = #tpu.pipeline_mode<synchronous>, transform_indices = @transform_4, window_bounds = array<i64: 1, 96>}, {pipeline_mode = #tpu.pipeline_mode<synchronous>, transform_indices = @transform_5, window_bounds = array<i64: 32, 32>}, {pipeline_mode = #tpu.pipeline_mode<synchronous>, transform_indices = @transform_6, window_bounds = array<i64: 1, 32>}, {pipeline_mode = #tpu.pipeline_mode<synchronous>, transform_indices = @transform_7, window_bounds = array<i64: 1, 32>}, {pipeline_mode = #tpu.pipeline_mode<synchronous>, transform_indices = @transform_8, window_bounds = array<i64: 1, 32>}, {pipeline_mode = #tpu.pipeline_mode<synchronous>, transform_indices = @transform_9, window_bounds = array<i64: 32, 128>}, {pipeline_mode = #tpu.pipeline_mode<synchronous>, transform_indices = @transform_10, window_bounds = array<i64: 1, 128>}, {pipeline_mode = #tpu.pipeline_mode<synchronous>, transform_indices = @transform_11, window_bounds = array<i64: 128, 32>}, {pipeline_mode = #tpu.pipeline_mode<synchronous>, transform_indices = @transform_12, window_bounds = array<i64: 1, 32>}, {transform_indices = @transform_13, window_bounds = array<i64: 1, 8, 32>}]} {
    %c0_i32 = arith.constant 0 : i32
    %0 = arith.cmpi eq, %arg1, %c0_i32 : i32
    %1 = arith.extui %0 : i1 to i32
    %c0_i32_0 = arith.constant 0 : i32
    %2 = arith.cmpi ne, %1, %c0_i32_0 : i32
    scf.if %2 {
      %c0_61 = arith.constant 0 : index
      %c0_62 = arith.constant 0 : index
      %c0_63 = arith.constant 0 : index
      %90 = vector.load %arg2[%c0_61, %c0_62, %c0_63] : memref<1x16x32xf32, #tpu.memory_space<vmem>>, vector<1x16x32xf32>
      %91 = vector.shape_cast %90 : vector<1x16x32xf32> to vector<16x32xf32>
      %c0_64 = arith.constant 0 : index
      %c0_65 = arith.constant 0 : index
      %92 = vector.load %arg3[%c0_64, %c0_65] : memref<1x32xf32, #tpu.memory_space<vmem>>, vector<1x32xf32>
      %c0_66 = arith.constant 0 : index
      %c0_67 = arith.constant 0 : index
      %93 = vector.load %arg4[%c0_66, %c0_67] : memref<1x32xf32, #tpu.memory_space<vmem>>, vector<1x32xf32>
      %cst_68 = arith.constant dense<0.000000e+00> : vector<16xf32>
      %94 = vector.multi_reduction <add>, %91, %cst_68 [1] : vector<16x32xf32> to vector<16xf32>
      %95 = vector.shape_cast %94 : vector<16xf32> to vector<16x1xf32>
      %cst_69 = arith.constant 3.200000e+01 : f32
      %96 = vector.broadcast %cst_69 : f32 to vector<16x1xf32>
      %97 = arith.divf %95, %96 : vector<16x1xf32>
      %98 = vector.broadcast %97 : vector<16x1xf32> to vector<16x32xf32>
      %99 = arith.subf %91, %98 : vector<16x32xf32>
      %100 = arith.mulf %99, %99 : vector<16x32xf32>
      %cst_70 = arith.constant dense<0.000000e+00> : vector<16xf32>
      %101 = vector.multi_reduction <add>, %100, %cst_70 [1] : vector<16x32xf32> to vector<16xf32>
      %102 = vector.shape_cast %101 : vector<16xf32> to vector<16x1xf32>
      %cst_71 = arith.constant 3.200000e+01 : f32
      %103 = vector.broadcast %cst_71 : f32 to vector<16x1xf32>
      %104 = arith.divf %102, %103 : vector<16x1xf32>
      %105 = vector.broadcast %97 : vector<16x1xf32> to vector<16x32xf32>
      %106 = arith.subf %91, %105 : vector<16x32xf32>
      %cst_72 = arith.constant 9.99999974E-6 : f32
      %107 = vector.broadcast %cst_72 : f32 to vector<16x1xf32>
      %108 = arith.addf %104, %107 : vector<16x1xf32>
      %109 = math.rsqrt %108 : vector<16x1xf32>
      %110 = vector.broadcast %109 : vector<16x1xf32> to vector<16x32xf32>
      %111 = arith.mulf %106, %110 : vector<16x32xf32>
      %112 = vector.broadcast %92 : vector<1x32xf32> to vector<16x32xf32>
      %113 = arith.mulf %111, %112 : vector<16x32xf32>
      %114 = vector.broadcast %93 : vector<1x32xf32> to vector<16x32xf32>
      %115 = arith.addf %113, %114 : vector<16x32xf32>
      %c0_73 = arith.constant 0 : index
      %c0_74 = arith.constant 0 : index
      %116 = vector.load %arg5[%c0_73, %c0_74] : memref<32x96xf32, #tpu.memory_space<vmem>>, vector<32x96xf32>
      %cst_75 = arith.constant dense<0.000000e+00> : vector<16x96xf32>
      %117 = tpu.matmul %115, %116, %cst_75 {dimension_numbers = #tpu.dot_dimension_numbers<[1], [0], [0], [1], [0, 0, 1, 1], [], []>} : vector<16x32xf32>, vector<32x96xf32>, vector<16x96xf32> -> vector<16x96xf32>
      %c0_76 = arith.constant 0 : index
      %c0_77 = arith.constant 0 : index
      %118 = vector.load %arg6[%c0_76, %c0_77] : memref<1x96xf32, #tpu.memory_space<vmem>>, vector<1x96xf32>
      %119 = vector.broadcast %118 : vector<1x96xf32> to vector<16x96xf32>
      %120 = arith.addf %117, %119 : vector<16x96xf32>
      %121 = vector.extract_strided_slice %120 {offsets = [0, 0], sizes = [16, 32], strides = [1, 1]} : vector<16x96xf32> to vector<16x32xf32>
      %122 = vector.shape_cast %121 : vector<16x32xf32> to vector<16x4x8xf32>
      %123 = vector.extract_strided_slice %120 {offsets = [0, 32], sizes = [16, 32], strides = [1, 1]} : vector<16x96xf32> to vector<16x32xf32>
      %124 = vector.shape_cast %123 : vector<16x32xf32> to vector<16x4x8xf32>
      %125 = vector.extract_strided_slice %120 {offsets = [0, 64], sizes = [16, 32], strides = [1, 1]} : vector<16x96xf32> to vector<16x32xf32>
      %126 = vector.shape_cast %125 : vector<16x32xf32> to vector<16x4x8xf32>
      %127 = tpu.transpose %122, [1, 0, 2] : vector<16x4x8xf32> -> vector<4x16x8xf32>
      %cst_78 = arith.constant 0.353553385 : f32
      %128 = vector.broadcast %cst_78 : f32 to vector<4x16x8xf32>
      %129 = arith.mulf %127, %128 : vector<4x16x8xf32>
      %c0_79 = arith.constant 0 : index
      %c0_80 = arith.constant 0 : index
      %c0_81 = arith.constant 0 : index
      %130 = vector.load %arg16[%c0_79, %c0_80, %c0_81] : memref<4x16x8xf32, #tpu.memory_space<vmem>>, vector<4x16x8xf32>
      tpu.vector_store %arg16[%c0_79, %c0_80, %c0_81], %129 {strides = array<i32>} : memref<4x16x8xf32, #tpu.memory_space<vmem>>, vector<4x16x8xf32>,
      %131 = tpu.transpose %124, [1, 0, 2] : vector<16x4x8xf32> -> vector<4x16x8xf32>
      %c0_82 = arith.constant 0 : index
      %c0_83 = arith.constant 0 : index
      %c0_84 = arith.constant 0 : index
      %132 = vector.load %arg17[%c0_82, %c0_83, %c0_84] : memref<4x16x8xf32, #tpu.memory_space<vmem>>, vector<4x16x8xf32>
      tpu.vector_store %arg17[%c0_82, %c0_83, %c0_84], %131 {strides = array<i32>} : memref<4x16x8xf32, #tpu.memory_space<vmem>>, vector<4x16x8xf32>,
      %133 = tpu.transpose %126, [1, 0, 2] : vector<16x4x8xf32> -> vector<4x16x8xf32>
      %c0_85 = arith.constant 0 : index
      %c0_86 = arith.constant 0 : index
      %c0_87 = arith.constant 0 : index
      %134 = vector.load %arg18[%c0_85, %c0_86, %c0_87] : memref<4x16x8xf32, #tpu.memory_space<vmem>>, vector<4x16x8xf32>
      tpu.vector_store %arg18[%c0_85, %c0_86, %c0_87], %133 {strides = array<i32>} : memref<4x16x8xf32, #tpu.memory_space<vmem>>, vector<4x16x8xf32>,
    } else {
    }
    %c8_i32 = arith.constant 8 : i32
    %3 = arith.muli %arg1, %c8_i32 : i32
    %4 = tpu.assume_multiple %3, 8 : i32
    %c0 = arith.constant 0 : index
    %5 = arith.index_cast %4 : i32 to index
    %c0_1 = arith.constant 0 : index
    %6 = vector.load %arg16[%c0, %5, %c0_1] : memref<4x16x8xf32, #tpu.memory_space<vmem>>, vector<4x8x8xf32>
    %c8_i32_2 = arith.constant 8 : i32
    %7 = arith.muli %arg1, %c8_i32_2 : i32
    %8 = tpu.iota {dimensions = array<i32: 0>} : vector<8x8xi32>
    %9 = vector.broadcast %7 : i32 to vector<8x8xi32>
    %10 = arith.addi %9, %8 : vector<8x8xi32>
    %cst = arith.constant 0xFF800000 : f32
    %11 = vector.broadcast %cst : f32 to vector<4x8x1xf32>
    %c0_3 = arith.constant 0 : index
    %c0_4 = arith.constant 0 : index
    %c0_5 = arith.constant 0 : index
    %12 = vector.load %arg19[%c0_3, %c0_4, %c0_5] : memref<4x8x1xf32, #tpu.memory_space<vmem>>, vector<4x8x1xf32>
    tpu.vector_store %arg19[%c0_3, %c0_4, %c0_5], %11 {strides = array<i32>} : memref<4x8x1xf32, #tpu.memory_space<vmem>>, vector<4x8x1xf32>,
    %cst_6 = arith.constant 0.000000e+00 : f32
    %13 = vector.broadcast %cst_6 : f32 to vector<4x8x1xf32>
    %c0_7 = arith.constant 0 : index
    %c0_8 = arith.constant 0 : index
    %c0_9 = arith.constant 0 : index
    %14 = vector.load %arg20[%c0_7, %c0_8, %c0_9] : memref<4x8x1xf32, #tpu.memory_space<vmem>>, vector<4x8x1xf32>
    tpu.vector_store %arg20[%c0_7, %c0_8, %c0_9], %13 {strides = array<i32>} : memref<4x8x1xf32, #tpu.memory_space<vmem>>, vector<4x8x1xf32>,
    %cst_10 = arith.constant 0.000000e+00 : f32
    %15 = vector.broadcast %cst_10 : f32 to vector<4x8x8xf32>
    %c0_11 = arith.constant 0 : index
    %c0_12 = arith.constant 0 : index
    %c0_13 = arith.constant 0 : index
    %16 = vector.load %arg21[%c0_11, %c0_12, %c0_13] : memref<4x8x8xf32, #tpu.memory_space<vmem>>, vector<4x8x8xf32>
    tpu.vector_store %arg21[%c0_11, %c0_12, %c0_13], %15 {strides = array<i32>} : memref<4x8x8xf32, #tpu.memory_space<vmem>>, vector<4x8x8xf32>,
    %c1_i32 = arith.constant 1 : i32
    %17 = arith.addi %arg1, %c1_i32 : i32
    %c0_i32_14 = arith.constant 0 : i32
    %18 = arith.subi %17, %c0_i32_14 : i32
    %c1_i32_15 = arith.constant 1 : i32
    %c1_i32_16 = arith.constant 1 : i32
    %19 = arith.subi %c1_i32_15, %c1_i32_16 : i32
    %20 = arith.addi %18, %19 : i32
    %c1_i32_17 = arith.constant 1 : i32
    %21 = arith.divsi %20, %c1_i32_17 : i32
    %c1_i32_18 = arith.constant 1 : i32
    %c0_i32_19 = arith.constant 0 : i32
    %c0_i32_20 = arith.constant 0 : i32
    %22 = arith.subi %21, %c0_i32_20 : i32
    %23 = arith.addi %c0_i32_20, %22 : i32
    %c1_i32_21 = arith.constant 1 : i32
    scf.for %arg22 = %c0_i32_20 to %23 step %c1_i32_21  : i32 {
      %90 = arith.muli %arg22, %c1_i32_18 : i32
      %91 = arith.addi %c0_i32_19, %90 : i32
      %c8_i32_61 = arith.constant 8 : i32
      %92 = arith.muli %91, %c8_i32_61 : i32
      %93 = tpu.assume_multiple %92, 8 : i32
      %c0_62 = arith.constant 0 : index
      %94 = arith.index_cast %93 : i32 to index
      %c0_63 = arith.constant 0 : index
      %95 = vector.load %arg17[%c0_62, %94, %c0_63] : memref<4x16x8xf32, #tpu.memory_space<vmem>>, vector<4x8x8xf32>
      %c0_64 = arith.constant 0 : index
      %96 = arith.index_cast %93 : i32 to index
      %c0_65 = arith.constant 0 : index
      %97 = vector.load %arg18[%c0_64, %96, %c0_65] : memref<4x16x8xf32, #tpu.memory_space<vmem>>, vector<4x8x8xf32>
      %cst_66 = arith.constant dense<0.000000e+00> : vector<4x8x8xf32>
      %98 = tpu.matmul %6, %95, %cst_66 {dimension_numbers = #tpu.dot_dimension_numbers<[2], [2], [1], [1], [0, 0, 0, 1, 1, 1], [0], [0]>} : vector<4x8x8xf32>, vector<4x8x8xf32>, vector<4x8x8xf32> -> vector<4x8x8xf32>
      %c8_i32_67 = arith.constant 8 : i32
      %99 = arith.muli %91, %c8_i32_67 : i32
      %100 = tpu.iota {dimensions = array<i32: 1>} : vector<8x8xi32>
      %101 = vector.broadcast %99 : i32 to vector<8x8xi32>
      %102 = arith.addi %101, %100 : vector<8x8xi32>
      %103 = arith.cmpi sge, %10, %102 : vector<8x8xi32>
      %104 = vector.shape_cast %103 : vector<8x8xi1> to vector<1x8x8xi1>
      %cst_68 = arith.constant -1.000000e+30 : f32
      %105 = vector.shape_cast %104 : vector<1x8x8xi1> to vector<1x8x8xi1>
      %106 = vector.broadcast %105 : vector<1x8x8xi1> to vector<4x8x8xi1>
      %107 = vector.broadcast %cst_68 : f32 to vector<4x8x8xf32>
      %108 = arith.select %106, %98, %107 : vector<4x8x8xi1>, vector<4x8x8xf32>
      %c0_69 = arith.constant 0 : index
      %c0_70 = arith.constant 0 : index
      %c0_71 = arith.constant 0 : index
      %109 = vector.load %arg19[%c0_69, %c0_70, %c0_71] : memref<4x8x1xf32, #tpu.memory_space<vmem>>, vector<4x8x1xf32>
      %cst_72 = arith.constant dense<0xFF800000> : vector<4x8xf32>
      %110 = vector.multi_reduction <maximumf>, %108, %cst_72 [2] : vector<4x8x8xf32> to vector<4x8xf32>
      %111 = vector.shape_cast %110 : vector<4x8xf32> to vector<4x8x1xf32>
      %112 = arith.maximumf %109, %111 : vector<4x8x1xf32>
      %113 = arith.subf %109, %112 : vector<4x8x1xf32>
      %114 = math.exp %113 : vector<4x8x1xf32>
      %115 = vector.broadcast %112 : vector<4x8x1xf32> to vector<4x8x8xf32>
      %116 = arith.subf %108, %115 : vector<4x8x8xf32>
      %117 = math.exp %116 : vector<4x8x8xf32>
      %c0_73 = arith.constant 0 : index
      %c0_74 = arith.constant 0 : index
      %c0_75 = arith.constant 0 : index
      %118 = vector.load %arg20[%c0_73, %c0_74, %c0_75] : memref<4x8x1xf32, #tpu.memory_space<vmem>>, vector<4x8x1xf32>
      %119 = arith.mulf %114, %118 : vector<4x8x1xf32>
      %cst_76 = arith.constant dense<0.000000e+00> : vector<4x8xf32>
      %120 = vector.multi_reduction <add>, %117, %cst_76 [2] : vector<4x8x8xf32> to vector<4x8xf32>
      %121 = vector.shape_cast %120 : vector<4x8xf32> to vector<4x8x1xf32>
      %122 = arith.addf %119, %121 : vector<4x8x1xf32>
      %c0_77 = arith.constant 0 : index
      %c0_78 = arith.constant 0 : index
      %c0_79 = arith.constant 0 : index
      %123 = vector.load %arg20[%c0_77, %c0_78, %c0_79] : memref<4x8x1xf32, #tpu.memory_space<vmem>>, vector<4x8x1xf32>
      tpu.vector_store %arg20[%c0_77, %c0_78, %c0_79], %122 {strides = array<i32>} : memref<4x8x1xf32, #tpu.memory_space<vmem>>, vector<4x8x1xf32>,
      %cst_80 = arith.constant dense<0.000000e+00> : vector<4x8x8xf32>
      %124 = tpu.matmul %117, %97, %cst_80 {dimension_numbers = #tpu.dot_dimension_numbers<[2], [1], [1], [2], [0, 0, 0, 1, 1, 2], [0], [0]>} : vector<4x8x8xf32>, vector<4x8x8xf32>, vector<4x8x8xf32> -> vector<4x8x8xf32>
      %c0_81 = arith.constant 0 : index
      %c0_82 = arith.constant 0 : index
      %c0_83 = arith.constant 0 : index
      %125 = vector.load %arg21[%c0_81, %c0_82, %c0_83] : memref<4x8x8xf32, #tpu.memory_space<vmem>>, vector<4x8x8xf32>
      %126 = vector.broadcast %114 : vector<4x8x1xf32> to vector<4x8x8xf32>
      %127 = arith.mulf %126, %125 : vector<4x8x8xf32>
      %128 = arith.addf %127, %124 : vector<4x8x8xf32>
      %c0_84 = arith.constant 0 : index
      %c0_85 = arith.constant 0 : index
      %c0_86 = arith.constant 0 : index
      %129 = vector.load %arg21[%c0_84, %c0_85, %c0_86] : memref<4x8x8xf32, #tpu.memory_space<vmem>>, vector<4x8x8xf32>
      tpu.vector_store %arg21[%c0_84, %c0_85, %c0_86], %128 {strides = array<i32>} : memref<4x8x8xf32, #tpu.memory_space<vmem>>, vector<4x8x8xf32>,
      %c0_87 = arith.constant 0 : index
      %c0_88 = arith.constant 0 : index
      %c0_89 = arith.constant 0 : index
      %130 = vector.load %arg19[%c0_87, %c0_88, %c0_89] : memref<4x8x1xf32, #tpu.memory_space<vmem>>, vector<4x8x1xf32>
      tpu.vector_store %arg19[%c0_87, %c0_88, %c0_89], %112 {strides = array<i32>} : memref<4x8x1xf32, #tpu.memory_space<vmem>>, vector<4x8x1xf32>,
    }
    %c0_22 = arith.constant 0 : index
    %c0_23 = arith.constant 0 : index
    %c0_24 = arith.constant 0 : index
    %24 = vector.load %arg21[%c0_22, %c0_23, %c0_24] : memref<4x8x8xf32, #tpu.memory_space<vmem>>, vector<4x8x8xf32>
    %c0_25 = arith.constant 0 : index
    %c0_26 = arith.constant 0 : index
    %c0_27 = arith.constant 0 : index
    %25 = vector.load %arg20[%c0_25, %c0_26, %c0_27] : memref<4x8x1xf32, #tpu.memory_space<vmem>>, vector<4x8x1xf32>
    %26 = vector.broadcast %25 : vector<4x8x1xf32> to vector<4x8x8xf32>
    %27 = arith.divf %24, %26 : vector<4x8x8xf32>
    %28 = tpu.transpose %27, [1, 0, 2] : vector<4x8x8xf32> -> vector<8x4x8xf32>
    %29 = vector.shape_cast %28 : vector<8x4x8xf32> to vector<8x32xf32>
    %c0_28 = arith.constant 0 : index
    %c0_29 = arith.constant 0 : index
    %30 = vector.load %arg7[%c0_28, %c0_29] : memref<32x32xf32, #tpu.memory_space<vmem>>, vector<32x32xf32>
    %cst_30 = arith.constant dense<0.000000e+00> : vector<8x32xf32>
    %31 = tpu.matmul %29, %30, %cst_30 {dimension_numbers = #tpu.dot_dimension_numbers<[1], [0], [0], [1], [0, 0, 1, 1], [], []>} : vector<8x32xf32>, vector<32x32xf32>, vector<8x32xf32> -> vector<8x32xf32>
    %c0_31 = arith.constant 0 : index
    %c0_32 = arith.constant 0 : index
    %32 = vector.load %arg8[%c0_31, %c0_32] : memref<1x32xf32, #tpu.memory_space<vmem>>, vector<1x32xf32>
    %33 = vector.broadcast %32 : vector<1x32xf32> to vector<8x32xf32>
    %34 = arith.addf %31, %33 : vector<8x32xf32>
    %c0_33 = arith.constant 0 : index
    %35 = arith.index_cast %4 : i32 to index
    %c0_34 = arith.constant 0 : index
    %36 = vector.load %arg2[%c0_33, %35, %c0_34] : memref<1x16x32xf32, #tpu.memory_space<vmem>>, vector<1x8x32xf32>
    %37 = vector.shape_cast %36 : vector<1x8x32xf32> to vector<8x32xf32>
    %38 = arith.addf %37, %34 : vector<8x32xf32>
    %c0_35 = arith.constant 0 : index
    %c0_36 = arith.constant 0 : index
    %39 = vector.load %arg9[%c0_35, %c0_36] : memref<1x32xf32, #tpu.memory_space<vmem>>, vector<1x32xf32>
    %c0_37 = arith.constant 0 : index
    %c0_38 = arith.constant 0 : index
    %40 = vector.load %arg10[%c0_37, %c0_38] : memref<1x32xf32, #tpu.memory_space<vmem>>, vector<1x32xf32>
    %cst_39 = arith.constant dense<0.000000e+00> : vector<8xf32>
    %41 = vector.multi_reduction <add>, %38, %cst_39 [1] : vector<8x32xf32> to vector<8xf32>
    %42 = vector.shape_cast %41 : vector<8xf32> to vector<8x1xf32>
    %cst_40 = arith.constant 3.200000e+01 : f32
    %43 = vector.broadcast %cst_40 : f32 to vector<8x1xf32>
    %44 = arith.divf %42, %43 : vector<8x1xf32>
    %45 = vector.broadcast %44 : vector<8x1xf32> to vector<8x32xf32>
    %46 = arith.subf %38, %45 : vector<8x32xf32>
    %47 = arith.mulf %46, %46 : vector<8x32xf32>
    %cst_41 = arith.constant dense<0.000000e+00> : vector<8xf32>
    %48 = vector.multi_reduction <add>, %47, %cst_41 [1] : vector<8x32xf32> to vector<8xf32>
    %49 = vector.shape_cast %48 : vector<8xf32> to vector<8x1xf32>
    %cst_42 = arith.constant 3.200000e+01 : f32
    %50 = vector.broadcast %cst_42 : f32 to vector<8x1xf32>
    %51 = arith.divf %49, %50 : vector<8x1xf32>
    %52 = vector.broadcast %44 : vector<8x1xf32> to vector<8x32xf32>
    %53 = arith.subf %38, %52 : vector<8x32xf32>
    %cst_43 = arith.constant 9.99999974E-6 : f32
    %54 = vector.broadcast %cst_43 : f32 to vector<8x1xf32>
    %55 = arith.addf %51, %54 : vector<8x1xf32>
    %56 = math.rsqrt %55 : vector<8x1xf32>
    %57 = vector.broadcast %56 : vector<8x1xf32> to vector<8x32xf32>
    %58 = arith.mulf %53, %57 : vector<8x32xf32>
    %59 = vector.broadcast %39 : vector<1x32xf32> to vector<8x32xf32>
    %60 = arith.mulf %58, %59 : vector<8x32xf32>
    %61 = vector.broadcast %40 : vector<1x32xf32> to vector<8x32xf32>
    %62 = arith.addf %60, %61 : vector<8x32xf32>
    %c0_44 = arith.constant 0 : index
    %c0_45 = arith.constant 0 : index
    %63 = vector.load %arg11[%c0_44, %c0_45] : memref<32x128xf32, #tpu.memory_space<vmem>>, vector<32x128xf32>
    %cst_46 = arith.constant dense<0.000000e+00> : vector<8x128xf32>
    %64 = tpu.matmul %62, %63, %cst_46 {dimension_numbers = #tpu.dot_dimension_numbers<[1], [0], [0], [1], [0, 0, 1, 1], [], []>} : vector<8x32xf32>, vector<32x128xf32>, vector<8x128xf32> -> vector<8x128xf32>
    %c0_47 = arith.constant 0 : index
    %c0_48 = arith.constant 0 : index
    %65 = vector.load %arg12[%c0_47, %c0_48] : memref<1x128xf32, #tpu.memory_space<vmem>>, vector<1x128xf32>
    %66 = vector.broadcast %65 : vector<1x128xf32> to vector<8x128xf32>
    %67 = arith.addf %64, %66 : vector<8x128xf32>
    %cst_49 = arith.constant 5.000000e-01 : f32
    %68 = vector.broadcast %cst_49 : f32 to vector<8x128xf32>
    %69 = arith.mulf %68, %67 : vector<8x128xf32>
    %cst_50 = arith.constant 4.471500e-02 : f32
    %70 = vector.broadcast %cst_50 : f32 to vector<8x128xf32>
    %71 = arith.mulf %70, %67 : vector<8x128xf32>
    %72 = arith.mulf %71, %67 : vector<8x128xf32>
    %73 = arith.mulf %72, %67 : vector<8x128xf32>
    %74 = arith.addf %67, %73 : vector<8x128xf32>
    %cst_51 = arith.constant 0.797884583 : f32
    %75 = vector.broadcast %cst_51 : f32 to vector<8x128xf32>
    %76 = arith.mulf %75, %74 : vector<8x128xf32>
    %77 = math.tanh %76 : vector<8x128xf32>
    %cst_52 = arith.constant 1.000000e+00 : f32
    %78 = vector.broadcast %cst_52 : f32 to vector<8x128xf32>
    %79 = arith.addf %78, %77 : vector<8x128xf32>
    %80 = arith.mulf %69, %79 : vector<8x128xf32>
    %c0_53 = arith.constant 0 : index
    %c0_54 = arith.constant 0 : index
    %81 = vector.load %arg13[%c0_53, %c0_54] : memref<128x32xf32, #tpu.memory_space<vmem>>, vector<128x32xf32>
    %cst_55 = arith.constant dense<0.000000e+00> : vector<8x32xf32>
    %82 = tpu.matmul %80, %81, %cst_55 {dimension_numbers = #tpu.dot_dimension_numbers<[1], [0], [0], [1], [0, 0, 1, 1], [], []>} : vector<8x128xf32>, vector<128x32xf32>, vector<8x32xf32> -> vector<8x32xf32>
    %c0_56 = arith.constant 0 : index
    %c0_57 = arith.constant 0 : index
    %83 = vector.load %arg14[%c0_56, %c0_57] : memref<1x32xf32, #tpu.memory_space<vmem>>, vector<1x32xf32>
    %84 = vector.broadcast %83 : vector<1x32xf32> to vector<8x32xf32>
    %85 = arith.addf %82, %84 : vector<8x32xf32>
    %86 = arith.addf %38, %85 : vector<8x32xf32>
    %c0_58 = arith.constant 0 : index
    %c0_59 = arith.constant 0 : index
    %c0_60 = arith.constant 0 : index
    %87 = vector.load %arg15[%c0_58, %c0_59, %c0_60] : memref<1x8x32xf32, #tpu.memory_space<vmem>>, vector<1x8x32xf32>
    %88 = vector.shape_cast %87 : vector<1x8x32xf32> to vector<8x32xf32>
    %89 = vector.shape_cast %86 : vector<8x32xf32> to vector<1x8x32xf32>
    tpu.vector_store %arg15[%c0_58, %c0_59, %c0_60], %89 {strides = array<i32>} : memref<1x8x32xf32, #tpu.memory_space<vmem>>, vector<1x8x32xf32>,
    return
  }
  func.func @transform_0(%arg0: i32, %arg1: i32) -> (i32, i32, i32) {
    %c0_i32 = arith.constant 0 : i32
    %c0_i32_0 = arith.constant 0 : i32
    %c0_i32_1 = arith.constant 0 : i32
    return %arg0, %c0_i32, %c0_i32_0 : i32, i32, i32
  }
  func.func @transform_1(%arg0: i32, %arg1: i32) -> (i32, i32) {
    %c0_i32 = arith.constant 0 : i32
    %c0_i32_0 = arith.constant 0 : i32
    %c0_i32_1 = arith.constant 0 : i32
    return %c0_i32, %c0_i32_0 : i32, i32
  }
  func.func @transform_2(%arg0: i32, %arg1: i32) -> (i32, i32) {
    %c0_i32 = arith.constant 0 : i32
    %c0_i32_0 = arith.constant 0 : i32
    %c0_i32_1 = arith.constant 0 : i32
    return %c0_i32, %c0_i32_0 : i32, i32
  }
  func.func @transform_3(%arg0: i32, %arg1: i32) -> (i32, i32) {
    %c0_i32 = arith.constant 0 : i32
    %c0_i32_0 = arith.constant 0 : i32
    %c0_i32_1 = arith.constant 0 : i32
    return %c0_i32, %c0_i32_0 : i32, i32
  }
  func.func @transform_4(%arg0: i32, %arg1: i32) -> (i32, i32) {
    %c0_i32 = arith.constant 0 : i32
    %c0_i32_0 = arith.constant 0 : i32
    %c0_i32_1 = arith.constant 0 : i32
    return %c0_i32, %c0_i32_0 : i32, i32
  }
  func.func @transform_5(%arg0: i32, %arg1: i32) -> (i32, i32) {
    %c0_i32 = arith.constant 0 : i32
    %c0_i32_0 = arith.constant 0 : i32
    %c0_i32_1 = arith.constant 0 : i32
    return %c0_i32, %c0_i32_0 : i32, i32
  }
  func.func @transform_6(%arg0: i32, %arg1: i32) -> (i32, i32) {
    %c0_i32 = arith.constant 0 : i32
    %c0_i32_0 = arith.constant 0 : i32
    %c0_i32_1 = arith.constant 0 : i32
    return %c0_i32, %c0_i32_0 : i32, i32
  }
  func.func @transform_7(%arg0: i32, %arg1: i32) -> (i32, i32) {
    %c0_i32 = arith.constant 0 : i32
    %c0_i32_0 = arith.constant 0 : i32
    %c0_i32_1 = arith.constant 0 : i32
    return %c0_i32, %c0_i32_0 : i32, i32
  }
  func.func @transform_8(%arg0: i32, %arg1: i32) -> (i32, i32) {
    %c0_i32 = arith.constant 0 : i32
    %c0_i32_0 = arith.constant 0 : i32
    %c0_i32_1 = arith.constant 0 : i32
    return %c0_i32, %c0_i32_0 : i32, i32
  }
  func.func @transform_9(%arg0: i32, %arg1: i32) -> (i32, i32) {
    %c0_i32 = arith.constant 0 : i32
    %c0_i32_0 = arith.constant 0 : i32
    %c0_i32_1 = arith.constant 0 : i32
    return %c0_i32, %c0_i32_0 : i32, i32
  }
  func.func @transform_10(%arg0: i32, %arg1: i32) -> (i32, i32) {
    %c0_i32 = arith.constant 0 : i32
    %c0_i32_0 = arith.constant 0 : i32
    %c0_i32_1 = arith.constant 0 : i32
    return %c0_i32, %c0_i32_0 : i32, i32
  }
  func.func @transform_11(%arg0: i32, %arg1: i32) -> (i32, i32) {
    %c0_i32 = arith.constant 0 : i32
    %c0_i32_0 = arith.constant 0 : i32
    %c0_i32_1 = arith.constant 0 : i32
    return %c0_i32, %c0_i32_0 : i32, i32
  }
  func.func @transform_12(%arg0: i32, %arg1: i32) -> (i32, i32) {
    %c0_i32 = arith.constant 0 : i32
    %c0_i32_0 = arith.constant 0 : i32
    %c0_i32_1 = arith.constant 0 : i32
    return %c0_i32, %c0_i32_0 : i32, i32
  }
  func.func @transform_13(%arg0: i32, %arg1: i32) -> (i32, i32, i32) {
    %c0_i32 = arith.constant 0 : i32
    %c0_i32_0 = arith.constant 0 : i32
    return %arg0, %arg1, %c0_i32 : i32, i32, i32
  }
}

</mosaic_0001>

<bundles_post_ra>
// kernel: tpu_custom_call.1
= control target key start
LH: loop header
LB: loop body
LE: loop exit
PB: predicated region body
PF: predicated region fallthrough
CT: control target
= control target key end

     0   :  { %s4023_s0 = inlined_call_operand.vmem [shape: f32[2,16,32], index: 0, kind: input, shape index: {}]   ;;  %s4024_s1 = inlined_call_operand.vmem [shape: f32[1,32], index: 1, kind: input, shape index: {}]   ;;  %s4025_s2 = inlined_call_operand.vmem [shape: f32[1,32], index: 2, kind: input, shape index: {}]   ;;  %s4026_s3 = inlined_call_operand.vmem [shape: f32[32,96], index: 3, kind: input, shape index: {}]   ;;  %s4027_s4 = inlined_call_operand.vmem [shape: f32[1,96], index: 4, kind: input, shape index: {}]   ;;  %s4028_s5 = inlined_call_operand.vmem [shape: f32[32,32], index: 5, kind: input, shape index: {}]   ;;  %s4029_s6 = inlined_call_operand.vmem [shape: f32[1,32], index: 6, kind: input, shape index: {}]   ;;  %s4030_s7 = inlined_call_operand.vmem [shape: f32[1,32], index: 7, kind: input, shape index: {}]   ;;  %s4031_s8 = inlined_call_operand.vmem [shape: f32[1,32], index: 8, kind: input, shape index: {}]   ;;  %s4032_s9 = inlined_call_operand.vmem [shape: f32[32,128], index: 9, kind: input, shape index: {}]   ;;  %s4033_s10 = inlined_call_operand.vmem [shape: f32[1,128], index: 10, kind: input, shape index: {}]   ;;  %s4034_s11 = inlined_call_operand.vmem [shape: f32[128,32], index: 11, kind: input, shape index: {}]   ;;  %s4035_s12 = inlined_call_operand.vmem [shape: f32[1,32], index: 12, kind: input, shape index: {}]   ;;  %s4036_s13 = inlined_call_operand.hbm [shape: f32[2,16,32], index: 13, kind: output, shape index: {}]  }
   0x1   :  { %4044 = sst [smem:[#allocation17_spill]] %s4023_s0 }
   0x2   :  { %18 = vsyncpa [#allocation9], 0 }
   0x3   :  { %20 = vsyncpa [#allocation9 + $0x1], 0  ;;  %s3430_s25 = smov 0   ;;  %s3432_s26 = smov 0  }
   0x4   :  { %s3434_s27 = smov 0   ;;  %s3436_s28 = smov 0  }
   0x5   :  { %s3438_s29 = smov 0   ;;  %s3440_s30 = smov 0  }
   0x6   :  { %s3442_s14 = smov 0   ;;  %s3444_s15 = smov 0  }
   0x7 LB: > { %4045 = sst [smem:[#allocation11_spill]] %s3306_s25  ;;  %s2891_s16 = sadd.s32 4294967295, %s3334_s15   ;;  %s3334_s15 = sphi %s3444_s15, %s26_s15   ;;  %s3330_s14 = sphi %s3442_s14, %s4062_s14   ;;  %s3326_s30 = sphi %s3440_s30, %s4061_s30   ;;  %s3322_s29 = sphi %s3438_s29, %s4060_s29   ;;  %s3318_s28 = sphi %s3436_s28, %s4059_s28   ;;  %s3314_s27 = sphi %s3434_s27, %s4065_s27   ;;  %s3310_s26 = sphi %s3432_s26, %s4064_s26   ;;  %s3306_s25 = sphi %s3430_s25, %s4063_s25  }
   0x8   : > { %4046 = sst [smem:[#allocation12_spill]] %s3326_s30  ;;  %s2892_s17 = sadd.s32 4294967294, %s3334_s15  }
   0x9   : > { %4047 = sst [smem:[#allocation13_spill]] %s3330_s14  ;;  %s35_s18 = sadd.s32 1, %s3326_s30 }
   0xa   : > { %p36_p0 = scmp.ge.s32.totalorder %s35_s18, 2  ;;  %s38_s19 = sadd.s32 1, %s3330_s14 }
   0xb   : > { %p335_p1 = scmp.ne.s32.totalorder %s3314_s27, %s3310_s26  ;;  %p336_p2 = scmp.eq.s32.totalorder %s2891_s16, 3 }
   0xc   : > { %s4067_s18 = smov (%p36_p0, %s35_s18), 0  ;;  %s4069_s19 = smov (!%p36_p0, %s38_s19), %s3330_s14 }
   0xd   : > { %4048 = sst [smem:[#allocation14_spill]] %s4067_s18  ;;  %s321_s20 = ssub.s32 %s3326_s30, %s4067_s18 }
   0xe   : > { %p3481_p3 = por %p336_p2, %p335_p1  ;;  %p40_p4 = scmp.ge.s32.totalorder %s4069_s19, 2 }
   0xf   : > { %p341_p5 = scmp.ne.s32.totalorder %s3310_s26, %s3306_s25  ;;  %p342_p6 = scmp.eq.s32.totalorder %s2892_s17, 3 }
  0x10   : > { %p2895_p7 = scmp.ge.s32.totalorder %s3334_s15, 1  ;;  %s4071_s19 = smov (%p40_p4, %s4069_s19), 0 }
  0x11   : > { %4050 = sst [smem:[#allocation15_spill]] %s4071_s19  ;;  %p3490_p8 = por %p342_p6, %p341_p5 }
  0x12   : > { %p404_p9 = scmp.lt.s32.totalorder %s3334_s15, 5  ;;  %s320_s23 = ssub.s32 %s3330_s14, %s4071_s19 }
  0x13   : > { %s4051_s22 = scalar_select %p3490_p8, 1, 0 }
  0x14   : > { %s325_s24 = sadd.s32 1, %s3314_s27  ;;  %s322_s16 = sor.u32 %s321_s20, %s320_s23 }
  0x15   : > { %4052 = sst [smem:[#allocation16_spill]] %s4051_s22  ;;  %p405_p10 = pnand %p2895_p7, %p404_p9 }
  0x16   : > { %p323_p11 = scmp.eq.s32.totalorder %s322_s16, 0  ;;  %s4043_s17 = sand.u32 (!%p405_p10), 1, %s3310_s26  }
  0x17   : > { %408 = sbr.rel (%p405_p10) target bundleno = 2749 (0xabd), region = 72  ;;  %p448_p12 = scmp.lt.s32.totalorder (!%p405_p10), %s3322_s29, 1 }
  0x18   : > { %s3499_s18 = scalar_select %p323_p11, %s3314_s27, %s325_s24  }
  0x19   : > { %s3505_s30 = sshll.u32 (!%p405_p10), %s4043_s17, 3  ;;  %s4053_s0 = sld [smem:[#allocation17_spill]] (!%p405_p10) }
  0x1a   : > { %p2899_p13 = scmp.ne.s32.totalorder (!%p405_p10), %s3318_s28, 0 }
  0x1c   : > { %s449_s22 = scalar_select %p448_p12, %s3322_s29, 1 }
  0x1d   : > { %456 = sbr.rel (%p2899_p13) target bundleno = 825 (0x339), region = 76  ;;  %s3340_s24 = smov (!%p2899_p13), 120  }
  0x1e   : > { %s2946_s25 = sshll.u32 %s449_s22, 4  ;;  %s3341_s16 = smov (!%p2899_p13), 112  }
  0x1f   : > { %s3511_s20 = scalar_lea.vmem %s4053_s0, %s2946_s25  ;;  %s3342_s25 = smov (!%p2899_p13), 104  }
  0x20   : > { %s3343_s14 = smov (!%p2899_p13), 96   ;;  %s3344_s19 = smov (!%p2899_p13), 64  }
  0x22   : > { %v457_v0 = vld [vmem:[%s3511_s20] sm:$0xff]  ;;  %vm461_vm0 = vcmask 261120   ;;  %v458_v1 = vld [vmem:[%s3511_s20 + $0x8] sm:$0xff]  ;;  %v508_v14 = vld [vmem:[%s4026_s3 + $0x18] sm:$0xff]  ;;  %v3345_v40 = vmov 1983009808   ;;  %v622_v42 = vlaneseq }
  0x23   : > { %v462_v2 = vsel %vm461_vm0, %v457_v0, 0.0  ;;  %v465_v3 = vsel %vm461_vm0, %v458_v1, 0.0  ;;  %v507_v15 = vld [vmem:[%s4026_s3 + $0x10] sm:$0xff]  ;;  %2996 = vmatprep.subr.mxu0 %v508_v14  ;;  %v506_v16 = vld [vmem:[%s4026_s3 + $0x8] sm:$0xff]  ;;  %v505_v17 = vld [vmem:[%s4026_s3] sm:$0xff]  ;;  %v620_v41 = vunpack.c.l.s4 %v3345_v40  ;;  %vm1217_vm1 = vcmask 64512  }
  0x24   : > { %463 = vadd.xlane.f32.xlu0 %v462_v2  ;;  %2997 = vmatpush3.msra.mxu0 %v508_v14  ;;  %v2900_v25 = vld [vmem:[%s4024_s1] ss:$0 sm:$0xff]  ;;  %v3346_v44 = vmov 1934713408   ;;  %v623_v48 = vshrl.u32 %v622_v42, 7 }
  0x25   : > { %2998 = vmatprep.subr.mxu0 %v507_v15  ;;  %v2901_v27 = vld [vmem:[%s4025_s2] ss:$0 sm:$0xff]  ;;  %v652_v45 = vunpack.c.l.s4 %v3346_v44  ;;  %v621_v47 = vunpack.c.0.s8 %v620_v41 }
  0x26   : > { %2999 = vmatpush3.msra.mxu0 %v507_v15  ;;  %v2902_v34 = vld [vmem:[%s4027_s4] ss:$0 sm:$0xff] }
  0x27   : > { %3000 = vmatprep.subr.mxu0 %v506_v16  ;;  %v653_v50 = vunpack.c.0.s8 %v652_v45  ;;  %v3555_v54 = vsub.s32 %v621_v47, %v623_v48 }
  0x28   : > { %466 = vadd.xlane.f32.xlu0 %v465_v3  ;;  %3001 = vmatpush3.msra.mxu0 %v506_v16 }
  0x29   : > { %3002 = vmatprep.subr.mxu0 %v505_v17  ;;  %v3558_v57 = vsub.s32 %v653_v50, %v623_v48 }
  0x2a   : > { %3003 = vmatpush3.msra.mxu0 %v505_v17 }
  0xad   : > { %v464_v4 = vpop.xlane.xlu0 %463 }
  0xae   : > { %v469_v5 = vmul.f32 0.03125, %v464_v4 }
  0xb0   : > { %v471_v6 = vsub.f32 %v457_v0, %v469_v5 }
  0xb1   : > { %v467_v7 = vpop.xlane.xlu0 %466 }
  0xb2   : > { %v470_v8 = vmul.f32 0.03125, %v467_v7  ;;  %v473_v9 = vmul.f32 %v471_v6, %v471_v6 }
  0xb4   : > { %v472_v10 = vsub.f32 %v458_v1, %v470_v8  ;;  %v475_v11 = vsel %vm461_vm0, %v473_v9, 0.0 }
  0xb5   : > { %476 = vadd.xlane.f32.xlu1 %v475_v11 }
  0xb6   : > { %v474_v12 = vmul.f32 %v472_v10, %v472_v10 }
  0xb8   : > { %v478_v13 = vsel %vm461_vm0, %v474_v12, 0.0 }
  0xb9   : > { %479 = vadd.xlane.f32.xlu1 %v478_v13 }
 0x13e   : > { %v477_v18 = vpop.xlane.xlu1 %476 }
 0x13f   : > { %v481_v19 = vmul.f32 0.03125, %v477_v18 }
 0x141   : > { %v483_v20 = vadd.f32 1e-05, %v481_v19 }
 0x142   : > { %v480_v21 = vpop.xlane.xlu1 %479 }
 0x143   : > { %3202 = vrsqrt.f32 %v483_v20  ;;  %v482_v22 = vmul.f32 0.03125, %v480_v21 }
 0x145   : > { %v484_v23 = vadd.f32 1e-05, %v482_v22 }
 0x147   : > { %3204 = vrsqrt.f32 %v484_v23 }
 0x150   : > { %v3203_v24 = vpop.eup %3202 }
 0x151   : > { %v487_v26 = vmul.f32 %v3203_v24, %v471_v6 }
 0x153   : > { %v495_v28 = vmul.f32 %v2900_v25, %v487_v26 }
 0x154   : > { %v3205_v29 = vpop.eup %3204 }
 0x155   : > { %v488_v30 = vmul.f32 %v3205_v29, %v472_v10  ;;  %v503_v31 = vadd.f32 %v2901_v27, %v495_v28 }
 0x157   : > { %v496_v32 = vmul.f32 %v2900_v25, %v488_v30  ;;  %3004 = vmatprep.mubr.msk.f32.mxu0 %vm461_vm0, %v503_v31 }
 0x159   : > { %v504_v33 = vadd.f32 %v2901_v27, %v496_v32 }
 0x15b   : > { %3005 = vmatmul.mubr.msk.f32.vlgmr.msra.gmra.mxu0 %vm461_vm0, %v504_v33 }
 0x21b   : > { %v3006_v35 = vpop.f32.mrf.mxu0 }
 0x21c   : > { %v594_v36 = vadd.f32 %v3006_v35, %v2902_v34 }
 0x21d   : > { %v588_v37 = vpop.f32.mrf.mxu0 }
 0x21e   : > { %v589_v38 = vadd.f32 %v2902_v34, %v588_v37  ;;  %601 = vrot.lane.b32.xlu1 %v594_v36, %s3340_s24 }
 0x220   : > { %599 = vrot.lane.b32.xlu0 %v589_v38, %s3340_s24 }
 0x222   : > { %607 = vrot.lane.b32.xlu1 %v594_v36, %s3341_s16 }
 0x224   : > { %611 = vrot.lane.b32.xlu0 %v589_v38, %s3342_s25 }
 0x226   : > { %605 = vrot.lane.b32.xlu1 %v589_v38, %s3341_s16 }
 0x228   : > { %753 = vrot.lane.b32.xlu0 %v589_v38, %s3343_s14 }
 0x22a   : > { %613 = vrot.lane.b32.xlu1 %v594_v36, %s3342_s25 }
 0x22c   : > { %913 = vrot.lane.b32.xlu0 %v589_v38, %s3344_s19 }
 0x22e   : > { %755 = vrot.lane.b32.xlu1 %v594_v36, %s3343_s14 }
 0x232   : > { %915 = vrot.lane.b32.xlu1 %v594_v36, %s3344_s19 }
 0x290   : > { %v602_v39 = vpop.permute.xlu1 %601 }
 0x291   : > { %759 = vrot.lane.b32.xlu1 %v602_v39, %s3343_s14 }
 0x292   : > { %v600_v43 = vpop.permute.xlu0 %599 }
 0x293   : > { %757 = vrot.lane.b32.xlu0 %v600_v43, %s3343_s14 }
 0x294   : > { %v608_v46 = vpop.permute.xlu1 %607 }
 0x295   : > { %763 = vrot.lane.b32.xlu1 %v608_v46, %s3343_s14  ;;  %v685_v62 = vcombine.low %v594_v36, %v608_v46  ;;  %v686_v63 = vcombine.high %v594_v36, %v608_v46 }
 0x296   : > { %v3551_v49 = vpop.permute.xlu0 %611 }
 0x297   : > { %v633_v51 = vcombine.low %v600_v43, %v3551_v49  ;;  %v634_v52 = vcombine.high %v600_v43, %v3551_v49  ;;  %v693_v11 = vrot.slane %v685_v62, %v3555_v54  ;;  %v700_v12 = vrot.slane %v686_v63, %v3555_v54 }
 0x298   : > { %v606_v53 = vpop.permute.xlu1 %605 }
 0x299   : > { %v617_v55 = vcombine.low %v589_v38, %v606_v53  ;;  %v618_v56 = vcombine.high %v589_v38, %v606_v53  ;;  %761 = vrot.lane.b32.xlu0 %v606_v53, %s3343_s14  ;;  %v641_v58 = vrot.slane %v633_v51, %v3555_v54  ;;  %v648_v59 = vrot.slane %v634_v52, %v3555_v54 }
 0x29b   : > { %v625_v60 = vrot.slane %v617_v55, %v3555_v54  ;;  %v632_v61 = vrot.slane %v618_v56, %v3555_v54 }
 0x29c   : > { %v614_v0 = vpop.permute.xlu1 %613 }
 0x29d   : > { %v649_v1 = vcombine.low %v625_v60, %v641_v58  ;;  %v650_v2 = vcombine.high %v625_v60, %v641_v58  ;;  %v665_v3 = vcombine.low %v632_v61, %v648_v59  ;;  %v666_v4 = vcombine.high %v632_v61, %v648_v59  ;;  %767 = vrot.lane.b32.xlu1 %v614_v0, %s3343_s14 }
 0x29e   : > { %v701_v5 = vcombine.low %v602_v39, %v614_v0  ;;  %v702_v6 = vcombine.high %v602_v39, %v614_v0  ;;  %765 = vrot.lane.b32.xlu0 %v3551_v49, %s3343_s14 }
 0x29f   : > { %v657_v7 = vrot.slane %v649_v1, %v3558_v57  ;;  %v664_v8 = vrot.slane %v650_v2, %v3558_v57  ;;  %v673_v9 = vrot.slane %v665_v3, %v3558_v57  ;;  %v680_v10 = vrot.slane %v666_v4, %v3558_v57 }
 0x2a0   : > { %v709_v13 = vrot.slane %v701_v5, %v3555_v54  ;;  %v716_v14 = vrot.slane %v702_v6, %v3555_v54 }
 0x2a1   : > { %v1073_v15 = vcombine.low %v657_v7, %v664_v8  ;;  %v2905_v16 = vcombine.high %v657_v7, %v664_v8  ;;  %v1089_v17 = vcombine.low %v673_v9, %v680_v10  ;;  %v2906_v18 = vcombine.high %v673_v9, %v680_v10  ;;  %919 = vrot.lane.b32.xlu1 %v602_v39, %s3344_s19  ;;  %v756_v9 = vpop.permute.xlu1 %755  ;;  %v754_v10 = vpop.permute.xlu0 %753 }
 0x2a2   : > { %v717_v19 = vcombine.low %v693_v11, %v709_v13  ;;  %v718_v20 = vcombine.high %v693_v11, %v709_v13  ;;  %v733_v21 = vcombine.low %v700_v12, %v716_v14  ;;  %v734_v22 = vcombine.high %v700_v12, %v716_v14  ;;  %917 = vrot.lane.b32.xlu0 %v600_v43, %s3344_s19 }
 0x2a3   : > { %v1080_v23 = vrot.slane %v1073_v15, %v3555_v54  ;;  %v1088_v24 = vrot.slane %v2905_v16, %v3555_v54  ;;  %v1096_v25 = vrot.slane %v1089_v17, %v3555_v54  ;;  %v1104_v26 = vrot.slane %v2906_v18, %v3555_v54 }
 0x2a4   : > { %v725_v27 = vrot.slane %v717_v19, %v3558_v57  ;;  %v732_v28 = vrot.slane %v718_v20, %v3558_v57  ;;  %v741_v29 = vrot.slane %v733_v21, %v3558_v57  ;;  %v748_v30 = vrot.slane %v734_v22, %v3558_v57 }
 0x2a5   : > { %v1105_v31 = vcombine.low %v1080_v23, %v1088_v24  ;;  %v1106_v32 = vcombine.high %v1080_v23, %v1088_v24  ;;  %v1121_v33 = vcombine.low %v1096_v25, %v1104_v26  ;;  %v1122_v34 = vcombine.high %v1096_v25, %v1104_v26  ;;  %923 = vrot.lane.b32.xlu1 %v608_v46, %s3344_s19  ;;  %v3610_v11 = vpop.permute.xlu1 %915  ;;  %v3612_v12 = vpop.permute.xlu0 %913 }
 0x2a6   : > { %v1141_v35 = vcombine.low %v725_v27, %v732_v28  ;;  %v2907_v36 = vcombine.high %v725_v27, %v732_v28  ;;  %v1157_v37 = vcombine.low %v741_v29, %v748_v30  ;;  %v2908_v38 = vcombine.high %v741_v29, %v748_v30  ;;  %921 = vrot.lane.b32.xlu0 %v606_v53, %s3344_s19 }
 0x2a7   : > { %v1113_v39 = vrot.slane %v1105_v31, %v3558_v57  ;;  %v1120_v40 = vrot.slane %v1106_v32, %v3558_v57  ;;  %v1129_v41 = vrot.slane %v1121_v33, %v3558_v57  ;;  %v1136_v42 = vrot.slane %v1122_v34, %v3558_v57 }
 0x2a8   : > { %v1148_v43 = vrot.slane %v1141_v35, %v3555_v54  ;;  %v1156_v44 = vrot.slane %v2907_v36, %v3555_v54  ;;  %v1164_v45 = vrot.slane %v1157_v37, %v3555_v54  ;;  %v1172_v46 = vrot.slane %v2908_v38, %v3555_v54 }
 0x2a9   : > { %v1137_v47 = vcombine.low %v1113_v39, %v1129_v41  ;;  %v1138_v48 = vcombine.high %v1113_v39, %v1129_v41  ;;  %v1139_v50 = vcombine.low %v1120_v40, %v1136_v42  ;;  %v1140_v51 = vcombine.high %v1120_v40, %v1136_v42  ;;  %927 = vrot.lane.b32.xlu1 %v614_v0, %s3344_s19 }
 0x2aa   : > { %v1173_v52 = vcombine.low %v1148_v43, %v1156_v44  ;;  %v1174_v53 = vcombine.high %v1148_v43, %v1156_v44  ;;  %v1189_v55 = vcombine.low %v1164_v45, %v1172_v46  ;;  %v1190_v56 = vcombine.high %v1164_v45, %v1172_v46  ;;  %925 = vrot.lane.b32.xlu0 %v3551_v49, %s3344_s19 }
 0x2ab   : > { %v1209_v58 = vmul.f32 0.35355338, %v1137_v47  ;;  %v1211_v59 = vmul.f32 0.35355338, %v1138_v48  ;;  %v1213_v60 = vmul.f32 0.35355338, %v1139_v50 }
 0x2ac   : > { %v1215_v61 = vmul.f32 0.35355338, %v1140_v51  ;;  %v1181_v62 = vrot.slane %v1173_v52, %v3558_v57  ;;  %v1188_v63 = vrot.slane %v1174_v53, %v3558_v57  ;;  %v1197_v1 = vrot.slane %v1189_v55, %v3558_v57 }
 0x2ad   : > { %1218 = vst.msk [vmem:[#allocation2] sm:$0xff] %vm1217_vm1, %v1209_v58  ;;  %1220 = vst.msk [vmem:[#allocation2 + $0x10] sm:$0xff] %vm1217_vm1, %v1211_v59  ;;  %v1204_v0 = vrot.slane %v1190_v56, %v3558_v57 }
 0x2ae   : > { %1222 = vst.msk [vmem:[#allocation2 + $0x20] sm:$0xff] %vm1217_vm1, %v1213_v60  ;;  %1224 = vst.msk [vmem:[#allocation2 + $0x30] sm:$0xff] %vm1217_vm1, %v1215_v61  ;;  %v1205_v49 = vcombine.low %v1181_v62, %v1197_v1  ;;  %v1206_v2 = vcombine.high %v1181_v62, %v1197_v1 }
 0x2af   : > { %v1207_v3 = vcombine.low %v1188_v63, %v1204_v0  ;;  %v1208_v4 = vcombine.high %v1188_v63, %v1204_v0 }
 0x2b0   : > { %v1210_v5 = vmul.f32 0.35355338, %v1205_v49  ;;  %v1212_v6 = vmul.f32 0.35355338, %v1206_v2 }
 0x2b1   : > { %v1214_v7 = vmul.f32 0.35355338, %v1207_v3  ;;  %v1216_v8 = vmul.f32 0.35355338, %v1208_v4 }
 0x2b2   : > { %1219 = vst.msk [vmem:[#allocation2 + $0x8] sm:$0xff] %vm1217_vm1, %v1210_v5  ;;  %1221 = vst.msk [vmem:[#allocation2 + $0x18] sm:$0xff] %vm1217_vm1, %v1212_v6 }
 0x2b3   : > { %1223 = vst.msk [vmem:[#allocation2 + $0x28] sm:$0xff] %vm1217_vm1, %v1214_v7  ;;  %1225 = vst.msk [vmem:[#allocation2 + $0x38] sm:$0xff] %vm1217_vm1, %v1216_v8 }
 0x303   : > { %v760_v13 = vpop.permute.xlu1 %759 }
 0x305   : > { %v758_v14 = vpop.permute.xlu0 %757 }
 0x307   : > { %v764_v15 = vpop.permute.xlu1 %763 }
 0x308   : > { %v845_v17 = vcombine.low %v756_v9, %v764_v15  ;;  %v846_v18 = vcombine.high %v756_v9, %v764_v15 }
 0x30a   : > { %v853_v27 = vrot.slane %v845_v17, %v3555_v54  ;;  %v860_v28 = vrot.slane %v846_v18, %v3555_v54 }
 0x30b   : > { %v762_v16 = vpop.permute.xlu0 %761 }
 0x30c   : > { %v777_v19 = vcombine.low %v754_v10, %v762_v16  ;;  %v778_v20 = vcombine.high %v754_v10, %v762_v16 }
 0x30e   : > { %v785_v31 = vrot.slane %v777_v19, %v3555_v54  ;;  %v792_v32 = vrot.slane %v778_v20, %v3555_v54 }
 0x30f   : > { %v768_v21 = vpop.permute.xlu1 %767 }
 0x310   : > { %v861_v22 = vcombine.low %v760_v13, %v768_v21  ;;  %v862_v23 = vcombine.high %v760_v13, %v768_v21  ;;  %v766_v24 = vpop.permute.xlu0 %765 }
 0x311   : > { %v793_v25 = vcombine.low %v758_v14, %v766_v24  ;;  %v794_v26 = vcombine.high %v758_v14, %v766_v24 }
 0x312   : > { %v869_v29 = vrot.slane %v861_v22, %v3555_v54  ;;  %v876_v30 = vrot.slane %v862_v23, %v3555_v54 }
 0x313   : > { %v801_v33 = vrot.slane %v793_v25, %v3555_v54  ;;  %v808_v34 = vrot.slane %v794_v26, %v3555_v54  ;;  %v3622_v39 = vpop.permute.xlu1 %919 }
 0x314   : > { %v877_v35 = vcombine.low %v853_v27, %v869_v29  ;;  %v878_v36 = vcombine.high %v853_v27, %v869_v29  ;;  %v893_v37 = vcombine.low %v860_v28, %v876_v30  ;;  %v894_v38 = vcombine.high %v860_v28, %v876_v30  ;;  %v3624_v40 = vpop.permute.xlu0 %917 }
 0x315   : > { %v809_v41 = vcombine.low %v785_v31, %v801_v33  ;;  %v810_v42 = vcombine.high %v785_v31, %v801_v33  ;;  %v825_v43 = vcombine.low %v792_v32, %v808_v34  ;;  %v826_v44 = vcombine.high %v792_v32, %v808_v34 }
 0x316   : > { %v885_v45 = vrot.slane %v877_v35, %v3558_v57  ;;  %v892_v46 = vrot.slane %v878_v36, %v3558_v57  ;;  %v901_v47 = vrot.slane %v893_v37, %v3558_v57  ;;  %v908_v48 = vrot.slane %v894_v38, %v3558_v57 }
 0x317   : > { %v817_v50 = vrot.slane %v809_v41, %v3558_v57  ;;  %v824_v51 = vrot.slane %v810_v42, %v3558_v57  ;;  %v833_v52 = vrot.slane %v825_v43, %v3558_v57  ;;  %v840_v53 = vrot.slane %v826_v44, %v3558_v57  ;;  %v924_v3 = vpop.permute.xlu1 %923 }
 0x318   : > { %v1294_v55 = vcombine.low %v885_v45, %v892_v46  ;;  %v2911_v56 = vcombine.high %v885_v45, %v892_v46  ;;  %v1310_v58 = vcombine.low %v901_v47, %v908_v48  ;;  %v2912_v59 = vcombine.high %v901_v47, %v908_v48  ;;  %v922_v4 = vpop.permute.xlu0 %921 }
 0x319   : > { %v1226_v60 = vcombine.low %v817_v50, %v824_v51  ;;  %v2909_v61 = vcombine.high %v817_v50, %v824_v51  ;;  %v1242_v62 = vcombine.low %v833_v52, %v840_v53  ;;  %v2910_v63 = vcombine.high %v833_v52, %v840_v53 }
 0x31a   : > { %v1301_v1 = vrot.slane %v1294_v55, %v3555_v54  ;;  %v1309_v0 = vrot.slane %v2911_v56, %v3555_v54  ;;  %v1317_v49 = vrot.slane %v1310_v58, %v3555_v54  ;;  %v1325_v2 = vrot.slane %v2912_v59, %v3555_v54 }
 0x31b   : > { %v1233_v5 = vrot.slane %v1226_v60, %v3555_v54  ;;  %v1241_v6 = vrot.slane %v2909_v61, %v3555_v54  ;;  %v1249_v7 = vrot.slane %v1242_v62, %v3555_v54  ;;  %v1257_v8 = vrot.slane %v2910_v63, %v3555_v54  ;;  %v928_v31 = vpop.permute.xlu1 %927 }
 0x31c   : > { %v1326_v9 = vcombine.low %v1301_v1, %v1309_v0  ;;  %v1327_v10 = vcombine.high %v1301_v1, %v1309_v0  ;;  %v1342_v13 = vcombine.low %v1317_v49, %v1325_v2  ;;  %v1343_v14 = vcombine.high %v1317_v49, %v1325_v2  ;;  %v926_v32 = vpop.permute.xlu0 %925 }
 0x31d   : > { %v1258_v15 = vcombine.low %v1233_v5, %v1241_v6  ;;  %v1259_v16 = vcombine.high %v1233_v5, %v1241_v6  ;;  %v1274_v17 = vcombine.low %v1249_v7, %v1257_v8  ;;  %v1275_v18 = vcombine.high %v1249_v7, %v1257_v8 }
 0x31e   : > { %v1334_v19 = vrot.slane %v1326_v9, %v3558_v57  ;;  %v1341_v20 = vrot.slane %v1327_v10, %v3558_v57  ;;  %v1350_v21 = vrot.slane %v1342_v13, %v3558_v57  ;;  %v1357_v22 = vrot.slane %v1343_v14, %v3558_v57 }
 0x31f   : > { %v1266_v23 = vrot.slane %v1258_v15, %v3558_v57  ;;  %v1273_v24 = vrot.slane %v1259_v16, %v3558_v57  ;;  %v1282_v25 = vrot.slane %v1274_v17, %v3558_v57  ;;  %v1289_v26 = vrot.slane %v1275_v18, %v3558_v57 }
 0x320   : > { %v1358_v27 = vcombine.low %v1334_v19, %v1350_v21  ;;  %v1359_v28 = vcombine.high %v1334_v19, %v1350_v21  ;;  %v1360_v29 = vcombine.low %v1341_v20, %v1357_v22  ;;  %v1361_v30 = vcombine.high %v1341_v20, %v1357_v22 }
 0x321   : > { %v1290_v33 = vcombine.low %v1266_v23, %v1282_v25  ;;  %v1291_v34 = vcombine.high %v1266_v23, %v1282_v25  ;;  %v1292_v35 = vcombine.low %v1273_v24, %v1289_v26  ;;  %v1293_v36 = vcombine.high %v1273_v24, %v1289_v26 }
 0x322   : > { %1363 = vst.msk [vmem:[#allocation3 + $0x8] sm:$0xff] %vm1217_vm1, %v1358_v27  ;;  %1365 = vst.msk [vmem:[#allocation3 + $0x18] sm:$0xff] %vm1217_vm1, %v1359_v28  ;;  %v1005_v37 = vcombine.low %v3610_v11, %v924_v3  ;;  %v1006_v38 = vcombine.high %v3610_v11, %v924_v3  ;;  %v937_v41 = vcombine.low %v3612_v12, %v922_v4 }
 0x323   : > { %1367 = vst.msk [vmem:[#allocation3 + $0x28] sm:$0xff] %vm1217_vm1, %v1360_v29  ;;  %1369 = vst.msk [vmem:[#allocation3 + $0x38] sm:$0xff] %vm1217_vm1, %v1361_v30  ;;  %v938_v42 = vcombine.high %v3612_v12, %v922_v4  ;;  %v1021_v43 = vcombine.low %v3622_v39, %v928_v31  ;;  %v1022_v44 = vcombine.high %v3622_v39, %v928_v31 }
 0x324   : > { %1362 = vst.msk [vmem:[#allocation3] sm:$0xff] %vm1217_vm1, %v1290_v33  ;;  %1364 = vst.msk [vmem:[#allocation3 + $0x10] sm:$0xff] %vm1217_vm1, %v1291_v34  ;;  %v953_v45 = vcombine.low %v3624_v40, %v926_v32  ;;  %v954_v11 = vcombine.high %v3624_v40, %v926_v32  ;;  %v1013_v46 = vrot.slane %v1005_v37, %v3555_v54 }
 0x325   : > { %1366 = vst.msk [vmem:[#allocation3 + $0x20] sm:$0xff] %vm1217_vm1, %v1292_v35  ;;  %1368 = vst.msk [vmem:[#allocation3 + $0x30] sm:$0xff] %vm1217_vm1, %v1293_v36  ;;  %v1020_v12 = vrot.slane %v1006_v38, %v3555_v54  ;;  %v1029_v47 = vrot.slane %v1021_v43, %v3555_v54  ;;  %v1036_v48 = vrot.slane %v1022_v44, %v3555_v54 }
 0x326   : > { %v961_v50 = vrot.slane %v953_v45, %v3555_v54  ;;  %v968_v51 = vrot.slane %v954_v11, %v3555_v54  ;;  %v945_v52 = vrot.slane %v937_v41, %v3555_v54  ;;  %v952_v39 = vrot.slane %v938_v42, %v3555_v54 }
 0x327   : > { %v1037_v53 = vcombine.low %v1013_v46, %v1029_v47  ;;  %v1038_v55 = vcombine.high %v1013_v46, %v1029_v47  ;;  %v1053_v56 = vcombine.low %v1020_v12, %v1036_v48  ;;  %v1054_v40 = vcombine.high %v1020_v12, %v1036_v48 }
 0x328   : > { %v969_v58 = vcombine.low %v945_v52, %v961_v50  ;;  %v970_v59 = vcombine.high %v945_v52, %v961_v50  ;;  %v985_v60 = vcombine.low %v952_v39, %v968_v51  ;;  %v986_v61 = vcombine.high %v952_v39, %v968_v51 }
 0x329   : > { %v1045_v62 = vrot.slane %v1037_v53, %v3558_v57  ;;  %v1052_v63 = vrot.slane %v1038_v55, %v3558_v57  ;;  %v1061_v1 = vrot.slane %v1053_v56, %v3558_v57  ;;  %v1068_v0 = vrot.slane %v1054_v40, %v3558_v57 }
 0x32a   : > { %v977_v49 = vrot.slane %v969_v58, %v3558_v57  ;;  %v984_v2 = vrot.slane %v970_v59, %v3558_v57  ;;  %v993_v3 = vrot.slane %v985_v60, %v3558_v57  ;;  %v1000_v4 = vrot.slane %v986_v61, %v3558_v57 }
 0x32b   : > { %v1438_v5 = vcombine.low %v1045_v62, %v1052_v63  ;;  %v2915_v6 = vcombine.high %v1045_v62, %v1052_v63  ;;  %v1454_v7 = vcombine.low %v1061_v1, %v1068_v0  ;;  %v2916_v8 = vcombine.high %v1061_v1, %v1068_v0 }
 0x32c   : > { %v1370_v9 = vcombine.low %v977_v49, %v984_v2  ;;  %v2913_v10 = vcombine.high %v977_v49, %v984_v2  ;;  %v1386_v13 = vcombine.low %v993_v3, %v1000_v4  ;;  %v2914_v14 = vcombine.high %v993_v3, %v1000_v4 }
 0x32d   : > { %v1445_v15 = vrot.slane %v1438_v5, %v3555_v54  ;;  %v1453_v16 = vrot.slane %v2915_v6, %v3555_v54  ;;  %v1461_v17 = vrot.slane %v1454_v7, %v3555_v54  ;;  %v1469_v18 = vrot.slane %v2916_v8, %v3555_v54 }
 0x32e   : > { %v1377_v19 = vrot.slane %v1370_v9, %v3555_v54  ;;  %v1385_v20 = vrot.slane %v2913_v10, %v3555_v54  ;;  %v1393_v21 = vrot.slane %v1386_v13, %v3555_v54  ;;  %v1401_v22 = vrot.slane %v2914_v14, %v3555_v54 }
 0x32f   : > { %v1470_v23 = vcombine.low %v1445_v15, %v1453_v16  ;;  %v1471_v24 = vcombine.high %v1445_v15, %v1453_v16  ;;  %v1486_v25 = vcombine.low %v1461_v17, %v1469_v18  ;;  %v1487_v26 = vcombine.high %v1461_v17, %v1469_v18 }
 0x330   : > { %v1402_v27 = vcombine.low %v1377_v19, %v1385_v20  ;;  %v1403_v28 = vcombine.high %v1377_v19, %v1385_v20  ;;  %v1418_v29 = vcombine.low %v1393_v21, %v1401_v22  ;;  %v1419_v30 = vcombine.high %v1393_v21, %v1401_v22 }
 0x331   : > { %v1478_v31 = vrot.slane %v1470_v23, %v3558_v57  ;;  %v1485_v32 = vrot.slane %v1471_v24, %v3558_v57  ;;  %v1494_v33 = vrot.slane %v1486_v25, %v3558_v57  ;;  %v1501_v34 = vrot.slane %v1487_v26, %v3558_v57 }
 0x332   : > { %v1410_v35 = vrot.slane %v1402_v27, %v3558_v57  ;;  %v1417_v54 = vrot.slane %v1403_v28, %v3558_v57  ;;  %v1426_v36 = vrot.slane %v1418_v29, %v3558_v57  ;;  %v1433_v37 = vrot.slane %v1419_v30, %v3558_v57 }
 0x333   : > { %v1502_v38 = vcombine.low %v1478_v31, %v1494_v33  ;;  %v1503_v41 = vcombine.high %v1478_v31, %v1494_v33  ;;  %v1504_v42 = vcombine.low %v1485_v32, %v1501_v34  ;;  %v1505_v43 = vcombine.high %v1485_v32, %v1501_v34 }
 0x334   : > { %v1434_v44 = vcombine.low %v1410_v35, %v1426_v36  ;;  %v1435_v45 = vcombine.high %v1410_v35, %v1426_v36  ;;  %v1436_v11 = vcombine.low %v1417_v54, %v1433_v37  ;;  %v1437_v46 = vcombine.high %v1417_v54, %v1433_v37 }
 0x335   : > { %1507 = vst.msk [vmem:[#allocation4 + $0x8] sm:$0xff] %vm1217_vm1, %v1502_v38  ;;  %1509 = vst.msk [vmem:[#allocation4 + $0x18] sm:$0xff] %vm1217_vm1, %v1503_v41 }
 0x336   : > { %1511 = vst.msk [vmem:[#allocation4 + $0x28] sm:$0xff] %vm1217_vm1, %v1504_v42  ;;  %1513 = vst.msk [vmem:[#allocation4 + $0x38] sm:$0xff] %vm1217_vm1, %v1505_v43 }
 0x337   : > { %1506 = vst.msk [vmem:[#allocation4] sm:$0xff] %vm1217_vm1, %v1434_v44  ;;  %1508 = vst.msk [vmem:[#allocation4 + $0x10] sm:$0xff] %vm1217_vm1, %v1435_v45 }
 0x338   : > { %1510 = vst.msk [vmem:[#allocation4 + $0x20] sm:$0xff] %vm1217_vm1, %v1436_v11  ;;  %1512 = vst.msk [vmem:[#allocation4 + $0x30] sm:$0xff] %vm1217_vm1, %v1437_v46 }
 0x339 PF: > { %s3707_s22 = sshll.u32 %s3318_s28, 3  ;;  %v1520_v57 = vlaneseq  ;;  %vm1524_vm2 = vcmask 7168   ;;  %s1538_s17 = sadd.s32 1, %s3318_s28  ;;  %v3347_v47 = vmov -inf   ;;  %v3348_v48 = vmov 0.0  }
 0x33a   : > { %v1522_v12 = vstv %s3707_s22  ;;  %1525 = vst.msk [vmem:[#allocation5] sm:$0xff] %vm1524_vm2, %v3347_v47  ;;  %1526 = vst.msk [vmem:[#allocation5 + $0x8] sm:$0xff] %vm1524_vm2, %v3347_v47  ;;  %vm1533_vm3 = vcmask 64512   ;;  %s1515_s23 = scalar_lea.vmem [#allocation2], %s3707_s22  ;;  %p2918_p0 = scmp.le.s32.totalorder %s1538_s17, 0 }
 0x33b   : > { %1527 = vst.msk [vmem:[#allocation5 + $0x10] sm:$0xff] %vm1524_vm2, %v3347_v47  ;;  %1528 = vst.msk [vmem:[#allocation5 + $0x18] sm:$0xff] %vm1524_vm2, %v3347_v47  ;;  %v3724_v50 = vld [vmem:[%s1515_s23] sm:$0xff]  ;;  %v3726_v51 = vld [vmem:[%s1515_s23 + $0x10] sm:$0xff]  ;;  %v3731_v39 = vshrl.u32 %v1520_v57, 7  ;;  %s3748_s24 = smov (!%p2918_p0), 0  }
 0x33c   : > { %1529 = vst.msk [vmem:[#allocation6] sm:$0xff] %vm1524_vm2, %v3348_v48  ;;  %1530 = vst.msk [vmem:[#allocation6 + $0x8] sm:$0xff] %vm1524_vm2, %v3348_v48  ;;  %v3728_v52 = vld [vmem:[%s1515_s23 + $0x20] sm:$0xff]  ;;  %v3741_v53 = vld [vmem:[%s1515_s23 + $0x30] sm:$0xff]  ;;  %2856 = sbr.rel (%p2918_p0) target bundleno = 1524 (0x5f4), region = 116 }
 0x33d   : > { %1531 = vst.msk [vmem:[#allocation6 + $0x10] sm:$0xff] %vm1524_vm2, %v3348_v48  ;;  %1532 = vst.msk [vmem:[#allocation6 + $0x18] sm:$0xff] %vm1524_vm2, %v3348_v48  ;;  %v3744_v55 = vadd.s32 %v1522_v12, %v3731_v39 }
 0x33e   : > { %1534 = vst.msk [vmem:[#allocation7] sm:$0xff] %vm1533_vm3, %v3348_v48  ;;  %1535 = vst.msk [vmem:[#allocation7 + $0x8] sm:$0xff] %vm1533_vm3, %v3348_v48 }
 0x33f   : > { %1536 = vst.msk [vmem:[#allocation7 + $0x10] sm:$0xff] %vm1533_vm3, %v3348_v48  ;;  %1537 = vst.msk [vmem:[#allocation7 + $0x18] sm:$0xff] %vm1533_vm3, %v3348_v48 }
 0x341 LB: >> { %v3349_v56 = vmov 0.0   ;;  %s3756_s16 = sshll.u32 %s3338_s24, 3  ;;  %vm3350_vm4 = vmmov 0   ;;  %v1861_v61 = vand.u32 127, %v1520_v57  ;;  %v3351_v17 = vmov 0   ;;  %v1871_v18 = vld [vmem:[#allocation5] sm:$0xff]  ;;  %s3338_s24 = sphi %s3748_s24, %s1542_s24  }
 0x342   : >> { %3007 = vmatprep.subr.mxu0 %v3349_v56  ;;  %3012 = vmatprep.subr.mxu1 %v3349_v56  ;;  %s1546_s25 = scalar_lea.vmem [#allocation3], %s3756_s16  ;;  %v1862_v62 = vstv %s3756_s16  ;;  %v3794_v21 = vld [vmem:[#allocation5 + $0x8] sm:$0xff]  ;;  %v1873_v22 = vld [vmem:[#allocation5 + $0x10] sm:$0xff]  ;;  %v3798_v29 = vld [vmem:[#allocation5 + $0x18] sm:$0xff]  ;;  %s3807_s14 = scalar_lea.vmem [#allocation4], %s3756_s16 }
 0x343   : >> { %3009 = vmatprep.mubr.msk.f32.mxu0 %vm3350_vm4, %v3349_v56  ;;  %3014 = vmatprep.mubr.msk.f32.mxu1 %vm3350_vm4, %v3349_v56  ;;  %v1547_v40 = vld [vmem:[%s1546_s25] sm:$0xff]  ;;  %v1548_v58 = vld [vmem:[%s1546_s25 + $0x10] sm:$0xff]  ;;  %v1863_v63 = vadd.s32 %v1862_v62, %v1861_v61  ;;  %s1542_s24 = sadd.s32 1, %s3338_s24  }
 0x344   : >> { %3008 = vmatpush3.xpose.msk.msra.mxu0 %vm1533_vm3, %v1547_v40  ;;  %3013 = vmatpush3.xpose.msk.msra.mxu1 %vm1533_vm3, %v1548_v58  ;;  %v1549_v59 = vld [vmem:[%s1546_s25 + $0x20] sm:$0xff]  ;;  %v1550_v60 = vld [vmem:[%s1546_s25 + $0x30] sm:$0xff]  ;;  %p1541_p1 = scmp.ge.s32.totalorder %s1542_s24, %s1538_s17 }
 0x345   : >> { %3017 = vmatprep.subr.mxu0 %v3349_v56  ;;  %3022 = vmatprep.subr.mxu1 %v3349_v56  ;;  %vm1864_vm5 = vcmp.ge.s32.totalorder %v3744_v55, %v1863_v63  ;;  %v1552_v35 = vld [vmem:[%s3807_s14] sm:$0xff]  ;;  %v1553_v54 = vld [vmem:[%s3807_s14 + $0x10] sm:$0xff] }
 0x346   : >> { %3206 = vset.pattern.permute.xlu0 %v3351_v17  ;;  %3207 = vset.pattern.permute.xlu1 %v3351_v17  ;;  %v1554_v58 = vld [vmem:[%s3807_s14 + $0x20] sm:$0xff]  ;;  %v1555_v62 = vld [vmem:[%s3807_s14 + $0x30] sm:$0xff] }
 0x347   : >> { %3010 = vmatmul.mubr.msk.f32.vlgmr.msra.gmra.mxu0 %vm1533_vm3, %v3724_v50  ;;  %3015 = vmatmul.mubr.msk.f32.vlgmr.msra.gmra.mxu1 %vm1533_vm3, %v3726_v51 }
 0x348   : >> { %3018 = vmatpush3.xpose.msk.msra.mxu0 %vm1533_vm3, %v1549_v59  ;;  %3019 = vmatprep.mubr.msk.f32.mxu0 %vm3350_vm4, %v3349_v56 }
 0x349   : >> { %3023 = vmatpush3.xpose.msk.msra.mxu1 %vm1533_vm3, %v1550_v60  ;;  %3024 = vmatprep.mubr.msk.f32.mxu1 %vm3350_vm4, %v3349_v56 }
 0x34a   : >> { %3027 = vmatprep.subr.mxu0 %v3349_v56  ;;  %3032 = vmatprep.subr.mxu1 %v3349_v56 }
 0x34b   : >> { %3020 = vmatmul.mubr.msk.f32.vlgmr.msra.gmra.mxu0 %vm1533_vm3, %v3728_v52 }
 0x34c   : >> { %3025 = vmatmul.mubr.msk.f32.vlgmr.msra.gmra.mxu1 %vm1533_vm3, %v3741_v53  ;;  %3029 = vmatprep.mubr.msk.f32.mxu0 %vm3350_vm4, %v3349_v56 }
 0x34d   : >> { %3034 = vmatprep.mubr.msk.f32.mxu1 %vm3350_vm4, %v3349_v56  ;;  %3028 = vmatpush3.msra.mxu0 %v1552_v35  ;;  %v2257_v35 = vld [vmem:[#allocation7 + $0x10] sm:$0xff] }
 0x34e   : >> { %3037 = vmatprep.subr.mxu0 %v3349_v56  ;;  %3033 = vmatpush3.msra.mxu1 %v1553_v54 }
 0x34f   : >> { %3042 = vmatprep.subr.mxu1 %v3349_v56 }
 0x407   : >> { %v1628_v1 = vpop.f32.mrf.mxu0  ;;  %v1704_v0 = vpop.f32.mrf.mxu1 }
 0x408   : >> { %v1867_v49 = vsel %vm1864_vm5, %v1628_v1, -1e+30  ;;  %v1868_v2 = vsel %vm1864_vm5, %v1704_v0, -1e+30 }
 0x409   : >> { %v3011_v3 = vpop.f32.mrf.mxu0  ;;  %v1875_v4 = vsel %vm1533_vm3, %v1867_v49, -inf  ;;  %v3016_v5 = vpop.f32.mrf.mxu1  ;;  %v1878_v7 = vsel %vm1533_vm3, %v1868_v2, -inf }
 0x40a   : >> { %1876 = vmax.xlane.f32.xlu0 %v1875_v4 }
 0x40b   : >> { %v1780_v6 = vpop.f32.mrf.mxu0 }
 0x40c   : >> { %v1869_v8 = vsel %vm1864_vm5, %v1780_v6, -1e+30  ;;  %v1856_v9 = vpop.f32.mrf.mxu1 }
 0x40d   : >> { %v3021_v10 = vpop.f32.mrf.mxu0  ;;  %v1870_v13 = vsel %vm1864_vm5, %v1856_v9, -1e+30  ;;  %v1881_v14 = vsel %vm1533_vm3, %v1869_v8, -inf  ;;  %v1935_v9 = vld [vmem:[#allocation6] sm:$0xff] }
 0x40e   : >> { %1879 = vmax.xlane.f32.xlu0 %v1878_v7  ;;  %1882 = vmax.xlane.f32.xlu1 %v1881_v14  ;;  %v3026_v15 = vpop.f32.mrf.mxu1  ;;  %v1884_v16 = vsel %vm1533_vm3, %v1870_v13, -inf  ;;  %v1936_v14 = vld [vmem:[#allocation6 + $0x8] sm:$0xff] }
 0x412   : >> { %1885 = vmax.xlane.f32.xlu1 %v1884_v16 }
 0x493   : >> { %v1877_v19 = vpop.xlane.xlu0 %1876 }
 0x494   : >> { %v1887_v20 = vmax.f32 %v1871_v18, %v1877_v19 }
 0x496   : >> { %v1891_v23 = vsub.f32 %v1871_v18, %v1887_v20  ;;  %2291 = vst.msk [vmem:[#allocation5] sm:$0xff] %vm1524_vm2, %v1887_v20  ;;  %1905 = vperm.xlu0 %3206, %v1887_v20   ;;  %v1937_v20 = vld [vmem:[#allocation6 + $0x10] sm:$0xff] }
 0x497   : >> { %v1880_v24 = vpop.xlane.xlu0 %1879  ;;  %v1883_v25 = vpop.xlane.xlu1 %1882 }
 0x498   : >> { %v1895_v26 = vmul.f32 1.442695, %v1891_v23  ;;  %v1888_v27 = vmax.f32 %v3794_v21, %v1880_v24  ;;  %v1889_v28 = vmax.f32 %v1873_v22, %v1883_v25  ;;  %v1938_v25 = vld [vmem:[#allocation6 + $0x18] sm:$0xff] }
 0x49a   : >> { %3208 = vpow2.f32 %v1895_v26  ;;  %v1892_v30 = vsub.f32 %v3794_v21, %v1888_v27  ;;  %2292 = vst.msk [vmem:[#allocation5 + $0x8] sm:$0xff] %vm1524_vm2, %v1888_v27  ;;  %1910 = vperm.xlu1 %3207, %v1888_v27   ;;  %v1893_v31 = vsub.f32 %v1873_v22, %v1889_v28  ;;  %2293 = vst.msk [vmem:[#allocation5 + $0x10] sm:$0xff] %vm1524_vm2, %v1889_v28  ;;  %v2255_v21 = vld [vmem:[#allocation7] sm:$0xff]  ;;  %v2256_v26 = vld [vmem:[#allocation7 + $0x8] sm:$0xff] }
 0x49b   : >> { %v1886_v32 = vpop.xlane.xlu1 %1885 }
 0x49c   : >> { %v1890_v33 = vmax.f32 %v3798_v29, %v1886_v32  ;;  %v1899_v60 = vmul.f32 1.442695, %v1893_v31 }
 0x49e   : >> { %1915 = vperm.xlu1 %3207, %v1889_v28   ;;  %v1894_v34 = vsub.f32 %v3798_v29, %v1890_v33  ;;  %2294 = vst.msk [vmem:[#allocation5 + $0x18] sm:$0xff] %vm1524_vm2, %v1890_v33 }
 0x4a0   : >> { %v1901_v6 = vmul.f32 1.442695, %v1894_v34 }
 0x4a2   : >> { %1920 = vperm.xlu1 %3207, %v1890_v33  }
 0x4a7   : >> { %v3209_v36 = vpop.eup %3208 }
 0x4a8   : >> { %2261 = vperm.xlu1 %3207, %v3209_v36   ;;  %v1939_v10 = vmul.f32 %v3209_v36, %v1935_v9 }
 0x511   : >> { %v1906_v37 = vpop.permute.xlu0 %1905 }
 0x512   : >> { %v1923_v38 = vsub.f32 %v1867_v49, %v1906_v37  ;;  %v1897_v49 = vmul.f32 1.442695, %v1892_v30 }
 0x514   : >> { %v1927_v41 = vmul.f32 1.442695, %v1923_v38 }
 0x515   : >> { %v1911_v42 = vpop.permute.xlu1 %1910 }
 0x516   : >> { %3210 = vpow2.f32 %v1927_v41  ;;  %v1924_v43 = vsub.f32 %v1868_v2, %v1911_v42  ;;  %v2258_v42 = vld [vmem:[#allocation7 + $0x18] sm:$0xff] }
 0x518   : >> { %v1929_v44 = vmul.f32 1.442695, %v1924_v43 }
 0x519   : >> { %v1916_v45 = vpop.permute.xlu1 %1915 }
 0x51a   : >> { %3212 = vpow2.f32 %v1929_v44  ;;  %v1925_v11 = vsub.f32 %v1869_v8, %v1916_v45 }
 0x51c   : >> { %v1931_v46 = vmul.f32 1.442695, %v1925_v11 }
 0x51d   : >> { %v1921_v12 = vpop.permute.xlu1 %1920 }
 0x51e   : >> { %3214 = vpow2.f32 %v1931_v46  ;;  %v1926_v47 = vsub.f32 %v1870_v13, %v1921_v12 }
 0x520   : >> { %v1933_v40 = vmul.f32 1.442695, %v1926_v47 }
 0x522   : >> { %3216 = vpow2.f32 %v1933_v40 }
 0x523   : >> { %v3211_v59 = vpop.eup %3210  ;;  %3218 = vpow2.f32 %v1899_v60  ;;  %v2262_v8 = vpop.permute.xlu1 %2261 }
 0x524   : >> { %3030 = vmatmul.mubr.msk.f32.vlgmr.msra.gmra.mxu0 %vm1533_vm3, %v3211_v59  ;;  %v1943_v61 = vsel %vm1533_vm3, %v3211_v59, 0.0  ;;  %3220 = vpow2.f32 %v1897_v49  ;;  %v2279_v23 = vmul.f32 %v2262_v8, %v2255_v21 }
 0x525   : >> { %1944 = vadd.xlane.f32.xlu1 %v1943_v61  ;;  %3038 = vmatpush3.msra.mxu0 %v1554_v58  ;;  %3222 = vpow2.f32 %v1901_v6 }
 0x526   : >> { %3039 = vmatprep.mubr.msk.f32.mxu0 %vm3350_vm4, %v3349_v56 }
 0x527   : >> { %v3213_v63 = vpop.eup %3212 }
 0x528   : >> { %3035 = vmatmul.mubr.msk.f32.vlgmr.msra.gmra.mxu1 %vm1533_vm3, %v3213_v63  ;;  %v1946_v1 = vsel %vm1533_vm3, %v3213_v63, 0.0 }
 0x529   : >> { %1947 = vadd.xlane.f32.xlu0 %v1946_v1  ;;  %3043 = vmatpush3.msra.mxu1 %v1555_v62 }
 0x52a   : >> { %3044 = vmatprep.mubr.msk.f32.mxu1 %vm3350_vm4, %v3349_v56 }
 0x52b   : >> { %v3215_v0 = vpop.eup %3214 }
 0x52c   : >> { %3040 = vmatmul.mubr.msk.f32.vlgmr.msra.gmra.mxu0 %vm1533_vm3, %v3215_v0  ;;  %v1949_v5 = vsel %vm1533_vm3, %v3215_v0, 0.0 }
 0x52f   : >> { %v3217_v2 = vpop.eup %3216 }
 0x530   : >> { %3045 = vmatmul.mubr.msk.f32.vlgmr.msra.gmra.mxu1 %vm1533_vm3, %v3217_v2  ;;  %v3219_v3 = vpop.eup %3218  ;;  %v1952_v7 = vsel %vm1533_vm3, %v3217_v2, 0.0 }
 0x531   : >> { %v3221_v4 = vpop.eup %3220  ;;  %v1941_v22 = vmul.f32 %v3219_v3, %v1937_v20 }
 0x532   : >> { %v3223_v56 = vpop.eup %3222  ;;  %v1940_v16 = vmul.f32 %v3221_v4, %v1936_v14 }
 0x533   : >> { %v1942_v32 = vmul.f32 %v3223_v56, %v1938_v25 }
 0x536   : >> { %2271 = vperm.xlu1 %3207, %v3219_v3  }
 0x53f   : >> { %2266 = vperm.xlu0 %3206, %v3221_v4  }
 0x55a   : >> { %1950 = vadd.xlane.f32.xlu1 %v1949_v5 }
 0x55e   : >> { %1953 = vadd.xlane.f32.xlu1 %v1952_v7 }
 0x56f   : >> { %2276 = vperm.xlu1 %3207, %v3223_v56  }
 0x5ae   : >> { %v1945_v13 = vpop.xlane.xlu1 %1944 }
 0x5af   : >> { %v1955_v15 = vadd.f32 %v1945_v13, %v1939_v10 }
 0x5b1   : >> { %1959 = vst.msk [vmem:[#allocation6] sm:$0xff] %vm1524_vm2, %v1955_v15 }
 0x5b2   : >> { %v1948_v17 = vpop.xlane.xlu0 %1947  ;;  %v2272_v19 = vpop.permute.xlu1 %2271 }
 0x5b3   : >> { %v1956_v18 = vadd.f32 %v1948_v17, %v1940_v16  ;;  %v2281_v41 = vmul.f32 %v2272_v19, %v2257_v35 }
 0x5b5   : >> { %1960 = vst.msk [vmem:[#allocation6 + $0x8] sm:$0xff] %vm1524_vm2, %v1956_v18 }
 0x5ba   : >> { %v2267_v27 = vpop.permute.xlu0 %2266 }
 0x5bb   : >> { %v2280_v33 = vmul.f32 %v2267_v27, %v2256_v26 }
 0x5e3   : >> { %v1951_v24 = vpop.xlane.xlu1 %1950 }
 0x5e4   : >> { %v1957_v28 = vadd.f32 %v1951_v24, %v1941_v22  ;;  %v2032_v29 = vpop.f32.mrf.mxu0 }
 0x5e5   : >> { %v2283_v30 = vadd.f32 %v2279_v23, %v2032_v29 }
 0x5e6   : >> { %1961 = vst.msk [vmem:[#allocation6 + $0x10] sm:$0xff] %vm1524_vm2, %v1957_v28  ;;  %v3031_v31 = vpop.f32.mrf.mxu0 }
 0x5e7   : >> { %2287 = vst.msk [vmem:[#allocation7] sm:$0xff] %vm1533_vm3, %v2283_v30  ;;  %v1954_v34 = vpop.xlane.xlu1 %1953 }
 0x5e8   : >> { %v1958_v54 = vadd.f32 %v1954_v34, %v1942_v32  ;;  %v2105_v36 = vpop.f32.mrf.mxu1 }
 0x5e9   : >> { %v2284_v37 = vadd.f32 %v2280_v33, %v2105_v36 }
 0x5ea   : >> { %1962 = vst.msk [vmem:[#allocation6 + $0x18] sm:$0xff] %vm1524_vm2, %v1958_v54  ;;  %v3036_v38 = vpop.f32.mrf.mxu1 }
 0x5eb   : >> { %2288 = vst.msk [vmem:[#allocation7 + $0x8] sm:$0xff] %vm1533_vm3, %v2284_v37  ;;  %v2277_v43 = vpop.permute.xlu1 %2276 }
 0x5ec   : >> { %v2178_v44 = vpop.f32.mrf.mxu0  ;;  %v2282_v46 = vmul.f32 %v2277_v43, %v2258_v42 }
 0x5ed   : >> { %v2285_v45 = vadd.f32 %v2281_v41, %v2178_v44 }
 0x5ee   : >> { %v3041_v11 = vpop.f32.mrf.mxu0 }
 0x5ef   : >> { %2289 = vst.msk [vmem:[#allocation7 + $0x10] sm:$0xff] %vm1533_vm3, %v2285_v45  ;;  %1544 = sbr.rel (!%p1541_p1) target bundleno = 833 (0x341), region = 122 }
 0x5f0   : >> { %v2251_v12 = vpop.f32.mrf.mxu1 }
 0x5f1   : >> { %v2286_v47 = vadd.f32 %v2282_v46, %v2251_v12 }
 0x5f2   : >> { %v3046_v40 = vpop.f32.mrf.mxu1 }
 0x5f3   : >> { %2290 = vst.msk [vmem:[#allocation7 + $0x18] sm:$0xff] %vm1533_vm3, %v2286_v47 }
 0x5f4 PF: > { %3047 = vmatprep.subr.mxu1 %v3348_v48  ;;  %3069 = vmatprep.subr.mxu0 %v3348_v48  ;;  %v3352_v60 = vmov 0   ;;  %v2487_v63 = vld [vmem:[%s4028_s5 + $0x18] sm:$0xff]  ;;  %v3353_v53 = vmov 1983009808   ;;  %v3354_v3 = vmov 1934713408   ;;  %s2569_s16 = scalar_lea.vmem %s3511_s20, %s3707_s22 }
 0x5f5   : > { %3225 = vset.pattern.permute.xlu1 %v3352_v60  ;;  %3224 = vset.pattern.permute.xlu0 %v3352_v60  ;;  %v2334_v55 = vunpack.c.l.s4 %v3353_v53  ;;  %v2366_v4 = vunpack.c.l.s4 %v3354_v3  ;;  %v2486_v30 = vld [vmem:[%s4028_s5 + $0x10] sm:$0xff]  ;;  %v2484_v38 = vld [vmem:[%s4028_s5] sm:$0xff]  ;;  %vm3355_vm6 = vmmov 0   ;;  %s3356_s23 = smov 16   ;;  %s3357_s17 = smov 8   ;;  %vm2480_vm7 = vcmask 130048  }
 0x5f6   : > { %v2299_v59 = vld [vmem:[#allocation6] sm:$0xff]  ;;  %v2300_v62 = vld [vmem:[#allocation6 + $0x8] sm:$0xff]  ;;  %3048 = vmatpush3.msra.mxu1 %v2487_v63  ;;  %3055 = vmatprep.mubr.msk.f32.mxu1 %vm3355_vm6, %v3348_v48  ;;  %s3358_s24 = smov 24   ;;  %vm2482_vm8 = vcmask 195584   ;;  %vm2495_vm9 = vcmask 261120   ;;  %s2942_s22 = sshll.u32 %s3322_s29, 1 }
 0x5f7   : > { %v2301_v58 = vld [vmem:[#allocation6 + $0x10] sm:$0xff]  ;;  %2305 = vperm.xlu0 %3224, %v2299_v59   ;;  %v2302_v61 = vld [vmem:[#allocation6 + $0x18] sm:$0xff]  ;;  %3049 = vmatprep.subr.mxu1 %v3348_v48  ;;  %v2335_v56 = vunpack.c.0.s8 %v2334_v55  ;;  %v2367_v14 = vunpack.c.0.s8 %v2366_v4  ;;  %s2802_s19 = sadd.s32 %s3318_s28, %s2942_s22  ;;  %s4056_s28 = sand.u32 1, %s3310_s26  }
 0x5f8   : > { %2315 = vperm.xlu1 %3225, %v2301_v58   ;;  %v2295_v0 = vld [vmem:[#allocation7] sm:$0xff]  ;;  %v2296_v8 = vld [vmem:[#allocation7 + $0x8] sm:$0xff]  ;;  %3050 = vmatpush3.msra.mxu1 %v2486_v30  ;;  %v2705_v30 = vld [vmem:[%s4034_s11 + $0x50] sm:$0xff]  ;;  %s2791_s22 = scalar_lea.sflag [#allocation9], %s4056_s28 }
 0x5f9   : > { %v2297_v1 = vld [vmem:[#allocation7 + $0x10] sm:$0xff]  ;;  %v2338_v18 = vsub.s32 %v2335_v56, %v3731_v39  ;;  %v2370_v21 = vsub.s32 %v2367_v14, %v3731_v39  ;;  %3051 = vmatprep.subr.mxu1 %v3348_v48  ;;  %v2485_v39 = vld [vmem:[%s4028_s5 + $0x8] sm:$0xff]  ;;  %3101 = vmatprep.mubr.msk.f32.mxu0 %vm3355_vm6, %v3348_v48 }
 0x5fa   : > { %v2298_v7 = vld [vmem:[#allocation7 + $0x18] sm:$0xff]  ;;  %3052 = vmatpush3.msra.mxu1 %v2485_v39  ;;  %v2603_v14 = vld [vmem:[%s4032_s9 + $0x8] sm:$0xff] }
 0x5fb   : > { %2310 = vperm.xlu0 %3224, %v2300_v62   ;;  %3053 = vmatprep.subr.mxu1 %v3348_v48  ;;  %v2700_v39 = vld [vmem:[%s4034_s11 + $0x28] sm:$0xff] }
 0x5fc   : > { %2320 = vperm.xlu1 %3225, %v2302_v61   ;;  %3054 = vmatpush3.msra.mxu1 %v2484_v38  ;;  %v2695_v38 = vld [vmem:[%s4034_s11] sm:$0xff] }
 0x5fd   : > { %3058 = vmatprep.subr.mxu1 %v3348_v48 }
 0x672   : > { %v2306_v50 = vpop.permute.xlu0 %2305 }
 0x673   : > { %v2316_v57 = vpop.permute.xlu1 %2315 }
 0x674   : > { %3226 = vrcp.f32 %v2316_v57 }
 0x675   : > { %3228 = vrcp.f32 %v2306_v50 }
 0x676   : > { %v2311_v52 = vpop.permute.xlu0 %2310 }
 0x677   : > { %v2321_v51 = vpop.permute.xlu1 %2320 }
 0x678   : > { %3230 = vrcp.f32 %v2321_v51 }
 0x679   : > { %3232 = vrcp.f32 %v2311_v52 }
 0x681   : > { %v3227_v49 = vpop.eup %3226 }
 0x682   : > { %v3229_v2 = vpop.eup %3228  ;;  %v2328_v5 = vmul.f32 %v3227_v49, %v2297_v1  ;;  %v2934_v1 = vld [vmem:[%s4029_s6] ss:$0 sm:$0xff] }
 0x683   : > { %v2324_v6 = vmul.f32 %v3229_v2, %v2295_v0  ;;  %v2570_v49 = vld [vmem:[%s2569_s16] sm:$0xff]  ;;  %s4054_s16 = scalar_lea.vmem [#allocation8], %s3505_s30 }
 0x684   : > { %s2806_s25 = sshll.u32 %s4054_s16, 4  ;;  %s4055_s29 = smov %s4054_s16  ;;  %s2807_s25 = int_to_ptr.vmem [resolvable:$true] %s2806_s25 }
 0x685   : > { %v3231_v9 = vpop.eup %3230  ;;  %v2331_v15 = vcombine.low %v2324_v6, %v2328_v5  ;;  %v2332_v16 = vcombine.high %v2324_v6, %v2328_v5 }
 0x686   : > { %v3233_v10 = vpop.eup %3232  ;;  %v2330_v13 = vmul.f32 %v3231_v9, %v2298_v7 }
 0x687   : > { %v2326_v17 = vmul.f32 %v3233_v10, %v2296_v8  ;;  %v2339_v22 = vrot.slane %v2331_v15, %v2338_v18  ;;  %v2346_v23 = vrot.slane %v2332_v16, %v2338_v18  ;;  %v2605_v10 = vld [vmem:[%s4032_s9 + $0x18] sm:$0xff]  ;;  %v2602_v15 = vld [vmem:[%s4032_s9] sm:$0xff] }
 0x689   : > { %v2347_v19 = vcombine.low %v2326_v17, %v2330_v13  ;;  %v2348_v20 = vcombine.high %v2326_v17, %v2330_v13  ;;  %v2604_v13 = vld [vmem:[%s4032_s9 + $0x10] sm:$0xff] }
 0x68b   : > { %v2355_v24 = vrot.slane %v2347_v19, %v2338_v18  ;;  %v2362_v25 = vrot.slane %v2348_v20, %v2338_v18  ;;  %v2936_v20 = vld [vmem:[%s4030_s7] ss:$0 sm:$0xff] }
 0x68d   : > { %v2363_v26 = vcombine.low %v2339_v22, %v2355_v24  ;;  %v2364_v27 = vcombine.high %v2339_v22, %v2355_v24  ;;  %v2379_v28 = vcombine.low %v2346_v23, %v2362_v25  ;;  %v2380_v29 = vcombine.high %v2346_v23, %v2362_v25  ;;  %v2937_v22 = vld [vmem:[%s4031_s8] ss:$0 sm:$0xff]  ;;  %v2710_v25 = vld [vmem:[%s4034_s11 + $0x78] sm:$0xff] }
 0x68e   : > { %3070 = vmatpush3.msra.mxu0 %v2710_v25 }
 0x68f   : > { %v2371_v31 = vrot.slane %v2363_v26, %v2370_v21  ;;  %v2378_v32 = vrot.slane %v2364_v27, %v2370_v21  ;;  %v2387_v33 = vrot.slane %v2379_v28, %v2370_v21  ;;  %v2394_v34 = vrot.slane %v2380_v29, %v2370_v21  ;;  %3071 = vmatprep.subr.mxu0 %v3348_v48  ;;  %v2709_v26 = vld [vmem:[%s4034_s11 + $0x70] sm:$0xff]  ;;  %v2708_v27 = vld [vmem:[%s4034_s11 + $0x68] sm:$0xff]  ;;  %v2707_v28 = vld [vmem:[%s4034_s11 + $0x60] sm:$0xff] }
 0x690   : > { %3072 = vmatpush3.msra.mxu0 %v2709_v26  ;;  %v2706_v29 = vld [vmem:[%s4034_s11 + $0x58] sm:$0xff] }
 0x691   : > { %v2399_v35 = vcombine.low %v2371_v31, %v2378_v32  ;;  %v2932_v54 = vcombine.high %v2371_v31, %v2378_v32  ;;  %v2415_v36 = vcombine.low %v2387_v33, %v2394_v34  ;;  %v2933_v37 = vcombine.high %v2387_v33, %v2394_v34  ;;  %3073 = vmatprep.subr.mxu0 %v3348_v48  ;;  %v2704_v31 = vld [vmem:[%s4034_s11 + $0x48] sm:$0xff]  ;;  %v2703_v32 = vld [vmem:[%s4034_s11 + $0x40] sm:$0xff]  ;;  %v2702_v33 = vld [vmem:[%s4034_s11 + $0x38] sm:$0xff] }
 0x692   : > { %3074 = vmatpush3.msra.mxu0 %v2708_v27  ;;  %v2701_v34 = vld [vmem:[%s4034_s11 + $0x30] sm:$0xff] }
 0x693   : > { %v2406_v41 = vrot.slane %v2399_v35, %v2338_v18  ;;  %v2414_v42 = vrot.slane %v2932_v54, %v2338_v18  ;;  %v2422_v43 = vrot.slane %v2415_v36, %v2338_v18  ;;  %v2430_v44 = vrot.slane %v2933_v37, %v2338_v18  ;;  %3075 = vmatprep.subr.mxu0 %v3348_v48  ;;  %v2699_v35 = vld [vmem:[%s4034_s11 + $0x20] sm:$0xff]  ;;  %v2698_v54 = vld [vmem:[%s4034_s11 + $0x18] sm:$0xff]  ;;  %v2697_v36 = vld [vmem:[%s4034_s11 + $0x10] sm:$0xff] }
 0x694   : > { %3076 = vmatpush3.msra.mxu0 %v2707_v28  ;;  %v2696_v37 = vld [vmem:[%s4034_s11 + $0x8] sm:$0xff] }
 0x695   : > { %v2432_v45 = vcombine.high %v2406_v41, %v2414_v42  ;;  %v2448_v11 = vcombine.high %v2422_v43, %v2430_v44  ;;  %v2431_v46 = vcombine.low %v2406_v41, %v2414_v42  ;;  %v2447_v12 = vcombine.low %v2422_v43, %v2430_v44  ;;  %3077 = vmatprep.subr.mxu0 %v3348_v48  ;;  %v2938_v41 = vld [vmem:[%s4033_s10] ss:$0 sm:$0xff] }
 0x696   : > { %3078 = vmatpush3.msra.mxu0 %v2706_v29 }
 0x697   : > { %v2446_v47 = vrot.slane %v2432_v45, %v2370_v21  ;;  %v2462_v40 = vrot.slane %v2448_v11, %v2370_v21  ;;  %v2439_v58 = vrot.slane %v2431_v46, %v2370_v21  ;;  %v2455_v59 = vrot.slane %v2447_v12, %v2370_v21  ;;  %3079 = vmatprep.subr.mxu0 %v3348_v48 }
 0x698   : > { %3080 = vmatpush3.msra.mxu0 %v2705_v30 }
 0x699   : > { %v2465_v60 = vcombine.low %v2446_v47, %v2462_v40  ;;  %v2464_v61 = vcombine.high %v2439_v58, %v2455_v59  ;;  %v2463_v62 = vcombine.low %v2439_v58, %v2455_v59  ;;  %v2466_v63 = vcombine.high %v2446_v47, %v2462_v40  ;;  %3081 = vmatprep.subr.mxu0 %v3348_v48 }
 0x69a   : > { %3082 = vmatpush3.msra.mxu0 %v2704_v31 }
 0x69b   : > { %2472 = vrot.lane.b32.xlu1 %v2465_v60, %s3356_s23  ;;  %2468 = vrot.lane.b32.xlu0 %v2464_v61, %s3357_s17  ;;  %v2940_v60 = vld [vmem:[%s4035_s12] ss:$0 sm:$0xff]  ;;  %s3238_s23 = scalar_lea.vmem %s2807_s25, 128 }
 0x69c   : > { %3083 = vmatprep.subr.mxu0 %v3348_v48  ;;  %p3239_p2 = scmp.ne.s32.totalorder %s2807_s25, %s3238_s23 }
 0x69d   : > { %3084 = vmatpush3.msra.mxu0 %v2703_v32 }
 0x69e   : > { %3085 = vmatprep.subr.mxu0 %v3348_v48  ;;  %p3240_p4 = pnand %p3239_p2, %p3481_p3 }
 0x69f   : > { %2476 = vrot.lane.b32.xlu0 %v2466_v63, %s3358_s24  ;;  %3086 = vmatpush3.msra.mxu0 %v2702_v33  ;;  %s2943_s24 = sshll.u32 %s2802_s19, 7  ;;  %s3359_s19 = smov [#allocation8]  }
 0x6a0   : > { %3087 = vmatprep.subr.mxu0 %v3348_v48  ;;  %s2804_s0 = scalar_lea.hbm %s4036_s13, %s2943_s24  ;;  %p3241_p5 = pneg %p3240_p4 }
 0x6a1   : > { %3088 = vmatpush3.msra.mxu0 %v2701_v34  ;;  %s3242_s17 = sshll.u32 %s3359_s19, 4  ;;  %s3243_s17 = int_to_ptr.vmem [resolvable:$false] %s3242_s17 }
 0x6a2   : > { %3089 = vmatprep.subr.mxu0 %v3348_v48  ;;  %s3244_s16 = scalar_lea.vmem %s3243_s17, 256  ;;  %p3245_p6 = scmp.lt.s32.totalorder %s2807_s25, %s3243_s17 }
 0x6a3   : > { %3090 = vmatpush3.msra.mxu0 %v2700_v39  ;;  %p3246_p7 = scmp.lt.s32.totalorder %s3244_s16, %s3238_s23 }
 0x6a4   : > { %3091 = vmatprep.subr.mxu0 %v3348_v48 }
 0x6a5   : > { %3092 = vmatpush3.msra.mxu0 %v2699_v35  ;;  %p3247_p9 = por %p3246_p7, %p3245_p6 }
 0x6a6   : > { %3093 = vmatprep.subr.mxu0 %v3348_v48 }
 0x6a7   : > { %3094 = vmatpush3.msra.mxu0 %v2698_v54  ;;  %p3248_p10 = pnand %p3247_p9, %p3241_p5 }
 0x6a8   : > { %3095 = vmatprep.subr.mxu0 %v3348_v48 }
 0x6a9   : > { %3096 = vmatpush3.msra.mxu0 %v2697_v36 }
 0x6aa   : > { %3097 = vmatprep.subr.mxu0 %v3348_v48 }
 0x6ab   : > { %3098 = vmatpush3.msra.mxu0 %v2696_v37 }
 0x6ac   : > { %3099 = vmatprep.subr.mxu0 %v3348_v48 }
 0x6ad   : > { %3100 = vmatpush3.msra.mxu0 %v2695_v38 }
 0x70d   : > { %v2469_v57 = vpop.permute.xlu0 %2468  ;;  %v2473_v50 = vpop.permute.xlu1 %2472 }
 0x70e   : > { %v2479_v51 = vsel %vm1533_vm3, %v2463_v62, %v2469_v57 }
 0x70f   : > { %v2481_v52 = vsel %vm2480_vm7, %v2479_v51, %v2473_v50 }
 0x711   : > { %v2477_v53 = vpop.permute.xlu0 %2476 }
 0x712   : > { %v2483_v55 = vsel %vm2482_vm8, %v2481_v52, %v2477_v53 }
 0x713   : > { %3056 = vmatmul.mubr.msk.f32.vlgmr.msra.gmra.mxu1 %vm2495_vm9, %v2483_v55 }
 0x714   : > { %3066 = vmatprep.mubr.msk.f32.mxu1 %vm3355_vm6, %v3348_v48  ;;  %3059 = vmatpush3.msra.mxu1 %v2605_v10 }
 0x715   : > { %3060 = vmatprep.subr.mxu1 %v3348_v48 }
 0x716   : > { %3061 = vmatpush3.msra.mxu1 %v2604_v13 }
 0x717   : > { %3062 = vmatprep.subr.mxu1 %v3348_v48 }
 0x718   : > { %3063 = vmatpush3.msra.mxu1 %v2603_v14 }
 0x719   : > { %3064 = vmatprep.subr.mxu1 %v3348_v48 }
 0x71a   : > { %3065 = vmatpush3.msra.mxu1 %v2602_v15 }
 0x7d3   : > { %v2565_v0 = vpop.f32.mrf.mxu1 }
 0x7d4   : > { %v2566_v2 = vadd.f32 %v2934_v1, %v2565_v0 }
 0x7d5   : > { %v3057_v3 = vpop.f32.mrf.mxu1 }
 0x7d6   : > { %v3873_v4 = vadd.f32 %v2570_v49, %v2566_v2 }
 0x7d8   : > { %v2574_v5 = vsel %vm2495_vm9, %v3873_v4, 0.0 }
 0x7d9   : > { %2575 = vadd.xlane.f32.xlu1 %v2574_v5 }
 0x862   : > { %v2576_v6 = vpop.xlane.xlu1 %2575 }
 0x863   : > { %v2578_v7 = vmul.f32 0.03125, %v2576_v6 }
 0x865   : > { %v2579_v56 = vsub.f32 %v3873_v4, %v2578_v7 }
 0x867   : > { %v2580_v8 = vmul.f32 %v2579_v56, %v2579_v56 }
 0x869   : > { %v2581_v9 = vsel %vm2495_vm9, %v2580_v8, 0.0 }
 0x86a   : > { %2582 = vadd.xlane.f32.xlu0 %v2581_v9 }
 0x8f3   : > { %v2583_v16 = vpop.xlane.xlu0 %2582 }
 0x8f4   : > { %v2584_v17 = vmul.f32 0.03125, %v2583_v16 }
 0x8f6   : > { %v2585_v18 = vadd.f32 1e-05, %v2584_v17 }
 0x8f8   : > { %3234 = vrsqrt.f32 %v2585_v18 }
 0x905   : > { %v3235_v19 = vpop.eup %3234 }
 0x906   : > { %v2587_v21 = vmul.f32 %v3235_v19, %v2579_v56 }
 0x908   : > { %v2594_v23 = vmul.f32 %v2936_v20, %v2587_v21 }
 0x90a   : > { %v2601_v24 = vadd.f32 %v2937_v22, %v2594_v23 }
 0x90c   : > { %3067 = vmatmul.mubr.msk.f32.vlgmr.msra.gmra.mxu1 %vm2495_vm9, %v2601_v24 }
 0x9cc   : > { %v2682_v42 = vpop.f32.mrf.mxu1 }
 0x9cd   : > { %v2683_v43 = vadd.f32 %v2938_v41, %v2682_v42 }
 0x9ce   : > { %v3068_v44 = vpop.f32.mrf.mxu1 }
 0x9cf   : > { %v2687_v45 = vmul.f32 0.044715, %v2683_v43  ;;  %v2686_v48 = vmul.f32 0.5, %v2683_v43 }
 0x9d1   : > { %v2688_v11 = vmul.f32 %v2687_v45, %v2683_v43 }
 0x9d3   : > { %v2689_v46 = vmul.f32 %v2688_v11, %v2683_v43 }
 0x9d5   : > { %v2690_v12 = vadd.f32 %v2689_v46, %v2683_v43 }
 0x9d7   : > { %v2691_v47 = vmul.f32 0.7978846, %v2690_v12 }
 0x9d9   : > { %3236 = vtanh.f32 %v2691_v47 }
 0x9e6   : > { %v3237_v40 = vpop.eup %3236 }
 0x9e7   : > { %v2693_v58 = vadd.f32 1.0, %v3237_v40 }
 0x9e9   : > { %v2694_v59 = vmul.f32 %v2693_v58, %v2686_v48 }
 0x9eb   : > { %3102 = vmatmul.mubr.f32.vlgmr.msra.gmra.mxu0 %v2694_v59 }
 0xaab   : > { %v2784_v61 = vpop.f32.mrf.mxu0 }
 0xaac   : > { %v2785_v62 = vadd.f32 %v2940_v60, %v2784_v61 }
 0xaad   : > { %v3103_v63 = vpop.f32.mrf.mxu0 }
 0xaae   : > { %v2788_v57 = vadd.f32 %v2785_v62, %v3873_v4 }
 0xab0   : > { %2789 = vst.msk [vmem:[%s4055_s29] sm:$0xff] %vm2495_vm9, %v2788_v57 }
 0xab1   : > { %3251 = shalt.err (!%p3248_p10)
}
 0xab2   : > { %s3252_s24 = scalar_lea.hbm %s2804_s0, 128  ;;  %s3256_s20 = scalar_lea.hbm %s4036_s13, 512 }
 0xab3   : > { %p3253_p11 = scmp.ne.s32.totalorder %s2804_s0, %s3252_s24  ;;  %p3257_p0 = scmp.lt.s32.totalorder %s2804_s0, %s4036_s13 }
 0xab4   : > { %p3258_p1 = scmp.lt.s32.totalorder %s3256_s20, %s3252_s24 }
 0xab5   : > { %p3254_p12 = pnand %p3253_p11, %p3481_p3 }
 0xab6   : > { %p3259_p2 = por %p3258_p1, %p3257_p0 }
 0xab7   : > { %p3255_p13 = pneg %p3254_p12 }
 0xab9   : > { %p3260_p4 = pnand %p3259_p2, %p3255_p13 }
 0xabb   : > { %3263 = shalt.err (!%p3260_p4)
}
 0xabc   : > { %3104 = dma.vmem_to_hbm [thread:$0]  (%p3481_p3), %s2807_s25, 128, %s2804_s0, %s2791_s22  }
 0xabd PF: > { %s4057_s23 = sld [smem:[#allocation11_spill]]  ;;  %p3110_p5 = scmp.ge.s32.totalorder %s3334_s15, 2 }
 0xabf   : > { %p3107_p6 = pnand %p3110_p5, %p3490_p8 }
 0xac1   : > { %p3108_p7 = pneg %p3107_p6 }
 0xac3   : > { %s2818_s17 = sand.u32 1, %s4057_s23  }
 0xac4   : > { %s2819_s16 = scalar_lea.sflag [#allocation9], %s2818_s17 }
 0xac5   : > { %3301 = dma.done.wait (%p3108_p7), %s2819_s16, 128  }
 0xac6   : > { %3303 = vsyncadd (%p3108_p7), %s2819_s16, 4294967168  ;;  %s26_s15 = sadd.s32 1, %s3334_s15   ;;  %s4059_s28 = sld [smem:[#allocation12_spill]] }
 0xac7   : > { %p23_p9 = scmp.ge.s32.totalorder %s26_s15, 6   ;;  %s4060_s29 = sld [smem:[#allocation13_spill]] }
 0xac8   : > { %s4061_s30 = sld [smem:[#allocation14_spill]]  ;;  %s4063_s25 = smov %s3310_s26 }
 0xac9   : > { %s4062_s14 = sld [smem:[#allocation15_spill]]  ;;  %s4064_s26 = smov %s3314_s27 }
 0xaca   : > { %s4065_s27 = smov %s3499_s18  ;;  %25 = sbr.rel (!%p23_p9) target bundleno = 7 (0x7), region = 133 }
 0xacf   :  { %2824 = vsyncpa [#allocation9], 1 }
 0xad0   :  { %2826 = vsyncpa [#allocation9 + $0x1], 1 }

</bundles_post_ra>
